<compile_context>
chip_gen: v6e
topology: v6e:2x2x1
jax: 0.10.0
libtpu: 0.0.40
codegen_flags: <defaults>
</compile_context>

<pallas_src>
import functools

import jax
import jax.numpy as jnp
from jax.experimental import pallas as pl
from jax.experimental.pallas import tpu as pltpu


# --------------------------------- the kernel ---------------------------------

def _upsample_fused_kernel(x_ref, w1_ref, b1_ref, m1_ref,
                           w2_ref, b2_ref, m2_ref,
                           wt_ref, bt_ref, o_ref, *, Wp, ext):
    # Flat padded domain: p = pi*Wp + pj over the (Hp, Wp) zero-padded image.
    #   x_ref : (1, C, L0)   L0 = S + 5*ext   (extended so every tap slice is in-bounds)
    #   h1    : (F, L1)      L1 = S + 3*ext
    #   h2    : (F, L2)      L2 = S + ext
    #   o_ref : (1, 4*F2, S) phase-blocked output, lane-dense (S = Hp*Wp lanes)
    #   m*_ref: (1, L*) f32  1 at interior pixels, 0 elsewhere (keeps halos exactly 0)
    #   b*_ref: (rows, 1) f32 biases, broadcast over lanes
    cdt = x_ref.dtype                      # MXU input dtype (bf16 or f32); accum is f32
    C = x_ref.shape[1]
    F = w1_ref.shape[0]
    L1 = m1_ref.shape[1]
    L2 = m2_ref.shape[1]
    S = o_ref.shape[2]

    # 3x3 tap offsets in the flat padded domain; slice start = ext + o  (>= 0).
    offs3 = tuple((dy - 1) * Wp + (dx - 1) for dy in range(3) for dx in range(3))
    # 2x2 polyphase taps of the transpose conv.
    offs4 = (0, 1, Wp, Wp + 1)

    def conv3x3(src, k, L, w, b, m):
        # Same-padded 3x3 conv, channel-major: sum of 9 shifted (F,k)x(k,L) matmuls.
        acc = None
        for t, o in enumerate(offs3):
            tap = src[:, ext + o: ext + o + L]                        # (k, L) lane slice
            d = jnp.dot(w[:, t * k:(t + 1) * k], tap,
                        preferred_element_type=jnp.float32)           # (F, L) f32
            acc = d if acc is None else acc + d
        # bias only at interior pixels; halo forced back to exact zero (next layer's
        # zero-padding semantics depend on it).
        return ((acc + b) * m).astype(cdt)

    x = x_ref[0]                                                       # (C, L0)
    w1 = w1_ref[...]
    w2 = w2_ref[...]
    wt = wt_ref[...]

    h1 = conv3x3(x, C, L1, w1, b1_ref[...], m1_ref[...])               # (F, L1)
    h2 = conv3x3(h1, F, L2, w2, b2_ref[...], m2_ref[...])              # (F, L2)

    # ConvTranspose2d(k=3, s=2, p=1, op=1), polyphase:
    #   y[(r,s,f), p] = sum_{di,dj,c} h2[c, p + di*Wp + dj] * Wpoly^T[(r,s,f),(di,dj,c)]
    acc = None
    for t, o in enumerate(offs4):
        tap = h2[:, o:o + S]                                           # (F, S)
        d = jnp.dot(wt[:, t * F:(t + 1) * F], tap,
                    preferred_element_type=jnp.float32)                # (4*F2, S) f32
        acc = d if acc is None else acc + d
    o_ref[0] = (acc + bt_ref[...]).astype(o_ref.dtype)                 # lane-dense store


# --------------------------------- wrapper -------------------------------------

def init_upsample_params(key, num_channels, num_filters, dtype=jnp.float32):
    """Deterministic synthetic parameters in PyTorch weight layouts."""
    F = num_filters
    ks = jax.random.split(key, 6)
    return dict(
        # nn.Conv2d weight: (out, in, kh, kw)
        w1=jax.random.normal(ks[0], (F, num_channels, 3, 3), dtype) * 0.1,
        b1=jax.random.normal(ks[1], (F,), dtype) * 0.1,
        w2=jax.random.normal(ks[2], (F, F, 3, 3), dtype) * 0.1,
        b2=jax.random.normal(ks[3], (F,), dtype) * 0.1,
        # nn.ConvTranspose2d weight: (in, out, kh, kw)
        wt=jax.random.normal(ks[4], (F, F // 2, 3, 3), dtype) * 0.1,
        bt=jax.random.normal(ks[5], (F // 2,), dtype) * 0.1,
    )


def upsample_forward(params, x_nchw, *, compute_dtype=jnp.bfloat16):
    """Forward pass of UpSample. Input/output are NCHW like PyTorch.

    compute_dtype=jnp.bfloat16 (default) runs the MXU matmuls in bf16 with f32
    accumulation; pass jnp.float32 to match the XLA reference within 2e-3.
    """
    N, C, H, W = x_nchw.shape
    F = params["w1"].shape[0]
    F2 = params["wt"].shape[1]
    Hp, Wp = H + 2, W + 2
    S = Hp * Wp                      # flat padded-image domain (lane axis)
    ext = Wp + 1                     # max |tap offset| of a 3x3 conv in the flat domain
    L2 = S + ext                     # h2 domain
    L1 = S + 3 * ext                 # h1 domain
    L0 = S + 5 * ext                 # shipped-x domain
    cdt = compute_dtype

    # ---- weight preprocessing (XLA side, channel-major layouts) ----------------
    # Conv2d (out,in,kh,kw) -> (out, (kh,kw,in)) so tap t uses columns [t*Cin:(t+1)*Cin]
    w1t = jnp.transpose(params["w1"], (0, 2, 3, 1)).reshape(F, 9 * C).astype(cdt)
    w2t = jnp.transpose(params["w2"], (0, 2, 3, 1)).reshape(F, 9 * F).astype(cdt)

    # ConvTranspose2d: flip spatially -> HWIO kernel, build polyphase weight
    # Wpoly[(di,dj,c), (r,s,f)], then transpose to (4*F2, 4*F) for channel-major dots.
    wf = jnp.transpose(params["wt"][:, :, ::-1, ::-1], (2, 3, 0, 1))   # (3,3,F,F2)
    Z = jnp.zeros((F, F2), wf.dtype)
    wt_poly = jnp.block([
        [wf[1, 1], wf[1, 0], wf[0, 1], wf[0, 0]],   # input tap (di,dj) = (0,0)
        [Z,        wf[1, 2], Z,        wf[0, 2]],   # (0,1)
        [Z,        Z,        wf[2, 1], wf[2, 0]],   # (1,0)
        [Z,        Z,        Z,        wf[2, 2]],   # (1,1)
    ])                                              # (4F, 4F2), cols ordered (r,s,f)
    wt_polyT = wt_poly.T.astype(cdt)                # (4F2, 4F)

    b1 = params["b1"].reshape(F, 1).astype(jnp.float32)
    b2 = params["b2"].reshape(F, 1).astype(jnp.float32)
    bt = jnp.tile(params["bt"], 4).reshape(4 * F2, 1).astype(jnp.float32)

    # Interior mask over the flat padded-image domain, positioned per layer domain.
    mcore = jnp.zeros((Hp, Wp), jnp.float32).at[1:H + 1, 1:W + 1].set(1.0).reshape(1, S)
    mask1 = jnp.pad(mcore, ((0, 0), (ext, 2 * ext)))        # (1, L1)
    mask2 = jnp.pad(mcore, ((0, 0), (0, ext)))              # (1, L2)

    # Input: zero-pad spatially (conv1's padding), flatten channel-major, extend the
    # flat domain with zeros so every in-kernel tap slice is a plain in-bounds slice.
    xp = jnp.pad(x_nchw, ((0, 0), (0, 0), (1, 1), (1, 1))).reshape(N, C, S)
    x0 = jnp.pad(xp, ((0, 0), (0, 0), (2 * ext, 3 * ext))).astype(cdt)   # (N, C, L0)

    kernel = functools.partial(_upsample_fused_kernel, Wp=Wp, ext=ext)

    y4 = pl.pallas_call(
        kernel,
        out_shape=jax.ShapeDtypeStruct((N, 4 * F2, S), x_nchw.dtype),
        grid_spec=pltpu.PrefetchScalarGridSpec(
            num_scalar_prefetch=0,
            grid=(N,),                 # batch; per-step overhead is ~0.35us, negligible
            in_specs=[                 # vs the per-image work, and "parallel" lets the
                pl.BlockSpec((1, C, L0), lambda n: (n, 0, 0)),   # two images land on
                pl.BlockSpec((F, 9 * C), lambda n: (0, 0)),      # both v7x TCs.
                pl.BlockSpec((F, 1), lambda n: (0, 0)),
                pl.BlockSpec((1, L1), lambda n: (0, 0)),
                pl.BlockSpec((F, 9 * F), lambda n: (0, 0)),
                pl.BlockSpec((F, 1), lambda n: (0, 0)),
                pl.BlockSpec((1, L2), lambda n: (0, 0)),
                pl.BlockSpec((4 * F2, 4 * F), lambda n: (0, 0)),
                pl.BlockSpec((4 * F2, 1), lambda n: (0, 0)),
            ],
            out_specs=pl.BlockSpec((1, 4 * F2, S), lambda n: (n, 0, 0)),
        ),
        compiler_params=pltpu.CompilerParams(
            dimension_semantics=("parallel",)),
    )(x0, w1t, b1, mask1, w2t, b2, mask2, wt_polyT, bt)

    # TODO(synk): the sub-pixel (r,s) phase interleave + interior crop stays in XLA;
    # doing it in-kernel needs stride-2 / gather stores that do not lower reliably.
    y = y4.reshape(N, 2, 2, F2, Hp, Wp)[..., 1:H + 1, 1:W + 1]   # (N,2,2,F2,H,W)
    y = jnp.transpose(y, (0, 3, 4, 1, 5, 2))                     # (N,F2,H,2,W,2)
    return y.reshape(N, F2, 2 * H, 2 * W)


# ------------------------------ XLA reference -----------------------------------

def _reference_forward(params, x_nchw):
    """Pure-XLA reference using lax convolutions (for correctness check)."""
    dn = ("NCHW", "OIHW", "NCHW")
    x = jax.lax.conv_general_dilated(x_nchw, params["w1"], (1, 1), [(1, 1), (1, 1)],
                                     dimension_numbers=dn)
    x = x + params["b1"][None, :, None, None]
    x = jax.lax.conv_general_dilated(x, params["w2"], (1, 1), [(1, 1), (1, 1)],
                                     dimension_numbers=dn)
    x = x + params["b2"][None, :, None, None]
    wt_oihw = jnp.transpose(params["wt"][:, :, ::-1, ::-1], (1, 0, 2, 3))
    y = jax.lax.conv_general_dilated(x, wt_oihw, (1, 1), [(1, 2), (1, 2)],
                                     lhs_dilation=(2, 2), dimension_numbers=dn)
    return y + params["bt"][None, :, None, None]


if __name__ == "__main__":
    num_channels, num_filters = 4, 8
    key = jax.random.PRNGKey(0)
    kx, kp = jax.random.split(key)

    x = jax.random.normal(kx, (2, num_channels, 16, 16), jnp.float32)  # NCHW
    params = init_upsample_params(kp, num_channels, num_filters)

    ref = _reference_forward(params, x)

    # strict f32 path
    out = jax.jit(functools.partial(upsample_forward, compute_dtype=jnp.float32))(params, x)
    out = jax.block_until_ready(out)
    assert out.shape == (2, num_filters // 2, 32, 32), out.shape
    assert jnp.allclose(out, ref, rtol=2e-3, atol=2e-3)

    # default bf16-MXU path (f32 accumulation) -- looser tolerance
    out_bf = jax.jit(upsample_forward)(params, x)
    out_bf = jax.block_until_ready(out_bf)
    assert out_bf.shape == (2, num_filters // 2, 32, 32), out_bf.shape
    assert jnp.allclose(out_bf, ref, rtol=5e-2, atol=5e-2)

    print("KERNEL_OK")
</pallas_src>

<mosaic_0001>
module attributes {stable_mosaic.version = 11 : i64} {
  func.func @_upsample_fused_kernel(%arg0: i32, %arg1: memref<1x4x419xf32, #tpu.memory_space<vmem>>, %arg2: memref<8x36xf32, #tpu.memory_space<vmem>>, %arg3: memref<8x1xf32, #tpu.memory_space<vmem>>, %arg4: memref<1x381xf32, #tpu.memory_space<vmem>>, %arg5: memref<8x72xf32, #tpu.memory_space<vmem>>, %arg6: memref<8x1xf32, #tpu.memory_space<vmem>>, %arg7: memref<1x343xf32, #tpu.memory_space<vmem>>, %arg8: memref<16x32xf32, #tpu.memory_space<vmem>>, %arg9: memref<16x1xf32, #tpu.memory_space<vmem>>, %arg10: memref<1x16x324xf32, #tpu.memory_space<vmem>>) attributes {dimension_semantics = [#tpu.dimension_semantics<parallel>], iteration_bounds = array<i64: 2>, scalar_prefetch = 0 : i64, scratch_operands = 0 : i64, tpu.core_type = #tpu.core_type<tc>, window_params = [{transform_indices = @transform_0, window_bounds = array<i64: 1, 4, 419>}, {pipeline_mode = #tpu.pipeline_mode<synchronous>, transform_indices = @transform_1, window_bounds = array<i64: 8, 36>}, {pipeline_mode = #tpu.pipeline_mode<synchronous>, transform_indices = @transform_2, window_bounds = array<i64: 8, 1>}, {pipeline_mode = #tpu.pipeline_mode<synchronous>, transform_indices = @transform_3, window_bounds = array<i64: 1, 381>}, {pipeline_mode = #tpu.pipeline_mode<synchronous>, transform_indices = @transform_4, window_bounds = array<i64: 8, 72>}, {pipeline_mode = #tpu.pipeline_mode<synchronous>, transform_indices = @transform_5, window_bounds = array<i64: 8, 1>}, {pipeline_mode = #tpu.pipeline_mode<synchronous>, transform_indices = @transform_6, window_bounds = array<i64: 1, 343>}, {pipeline_mode = #tpu.pipeline_mode<synchronous>, transform_indices = @transform_7, window_bounds = array<i64: 16, 32>}, {pipeline_mode = #tpu.pipeline_mode<synchronous>, transform_indices = @transform_8, window_bounds = array<i64: 16, 1>}, {transform_indices = @transform_9, window_bounds = array<i64: 1, 16, 324>}]} {
    %c0 = arith.constant 0 : index
    %c0_0 = arith.constant 0 : index
    %c0_1 = arith.constant 0 : index
    %0 = vector.load %arg1[%c0, %c0_0, %c0_1] : memref<1x4x419xf32, #tpu.memory_space<vmem>>, vector<1x4x419xf32>
    %1 = vector.shape_cast %0 : vector<1x4x419xf32> to vector<4x419xf32>
    %c0_2 = arith.constant 0 : index
    %c0_3 = arith.constant 0 : index
    %2 = vector.load %arg2[%c0_2, %c0_3] : memref<8x36xf32, #tpu.memory_space<vmem>>, vector<8x36xf32>
    %c0_4 = arith.constant 0 : index
    %c0_5 = arith.constant 0 : index
    %3 = vector.load %arg5[%c0_4, %c0_5] : memref<8x72xf32, #tpu.memory_space<vmem>>, vector<8x72xf32>
    %c0_6 = arith.constant 0 : index
    %c0_7 = arith.constant 0 : index
    %4 = vector.load %arg8[%c0_6, %c0_7] : memref<16x32xf32, #tpu.memory_space<vmem>>, vector<16x32xf32>
    %c0_8 = arith.constant 0 : index
    %c0_9 = arith.constant 0 : index
    %5 = vector.load %arg3[%c0_8, %c0_9] : memref<8x1xf32, #tpu.memory_space<vmem>>, vector<8x1xf32>
    %c0_10 = arith.constant 0 : index
    %c0_11 = arith.constant 0 : index
    %6 = vector.load %arg4[%c0_10, %c0_11] : memref<1x381xf32, #tpu.memory_space<vmem>>, vector<1x381xf32>
    %7 = vector.extract_strided_slice %1 {offsets = [0, 0], sizes = [4, 381], strides = [1, 1]} : vector<4x419xf32> to vector<4x381xf32>
    %8 = vector.extract_strided_slice %2 {offsets = [0, 0], sizes = [8, 4], strides = [1, 1]} : vector<8x36xf32> to vector<8x4xf32>
    %cst = arith.constant dense<0.000000e+00> : vector<8x381xf32>
    %9 = tpu.matmul %8, %7, %cst {dimension_numbers = #tpu.dot_dimension_numbers<[1], [0], [0], [1], [0, 0, 1, 1], [], []>} : vector<8x4xf32>, vector<4x381xf32>, vector<8x381xf32> -> vector<8x381xf32>
    %10 = vector.extract_strided_slice %1 {offsets = [0, 1], sizes = [4, 381], strides = [1, 1]} : vector<4x419xf32> to vector<4x381xf32>
    %11 = vector.extract_strided_slice %2 {offsets = [0, 4], sizes = [8, 4], strides = [1, 1]} : vector<8x36xf32> to vector<8x4xf32>
    %cst_12 = arith.constant dense<0.000000e+00> : vector<8x381xf32>
    %12 = tpu.matmul %11, %10, %cst_12 {dimension_numbers = #tpu.dot_dimension_numbers<[1], [0], [0], [1], [0, 0, 1, 1], [], []>} : vector<8x4xf32>, vector<4x381xf32>, vector<8x381xf32> -> vector<8x381xf32>
    %13 = arith.addf %9, %12 : vector<8x381xf32>
    %14 = vector.extract_strided_slice %1 {offsets = [0, 2], sizes = [4, 381], strides = [1, 1]} : vector<4x419xf32> to vector<4x381xf32>
    %15 = vector.extract_strided_slice %2 {offsets = [0, 8], sizes = [8, 4], strides = [1, 1]} : vector<8x36xf32> to vector<8x4xf32>
    %cst_13 = arith.constant dense<0.000000e+00> : vector<8x381xf32>
    %16 = tpu.matmul %15, %14, %cst_13 {dimension_numbers = #tpu.dot_dimension_numbers<[1], [0], [0], [1], [0, 0, 1, 1], [], []>} : vector<8x4xf32>, vector<4x381xf32>, vector<8x381xf32> -> vector<8x381xf32>
    %17 = arith.addf %13, %16 : vector<8x381xf32>
    %18 = vector.extract_strided_slice %1 {offsets = [0, 18], sizes = [4, 381], strides = [1, 1]} : vector<4x419xf32> to vector<4x381xf32>
    %19 = vector.extract_strided_slice %2 {offsets = [0, 12], sizes = [8, 4], strides = [1, 1]} : vector<8x36xf32> to vector<8x4xf32>
    %cst_14 = arith.constant dense<0.000000e+00> : vector<8x381xf32>
    %20 = tpu.matmul %19, %18, %cst_14 {dimension_numbers = #tpu.dot_dimension_numbers<[1], [0], [0], [1], [0, 0, 1, 1], [], []>} : vector<8x4xf32>, vector<4x381xf32>, vector<8x381xf32> -> vector<8x381xf32>
    %21 = arith.addf %17, %20 : vector<8x381xf32>
    %22 = vector.extract_strided_slice %1 {offsets = [0, 19], sizes = [4, 381], strides = [1, 1]} : vector<4x419xf32> to vector<4x381xf32>
    %23 = vector.extract_strided_slice %2 {offsets = [0, 16], sizes = [8, 4], strides = [1, 1]} : vector<8x36xf32> to vector<8x4xf32>
    %cst_15 = arith.constant dense<0.000000e+00> : vector<8x381xf32>
    %24 = tpu.matmul %23, %22, %cst_15 {dimension_numbers = #tpu.dot_dimension_numbers<[1], [0], [0], [1], [0, 0, 1, 1], [], []>} : vector<8x4xf32>, vector<4x381xf32>, vector<8x381xf32> -> vector<8x381xf32>
    %25 = arith.addf %21, %24 : vector<8x381xf32>
    %26 = vector.extract_strided_slice %1 {offsets = [0, 20], sizes = [4, 381], strides = [1, 1]} : vector<4x419xf32> to vector<4x381xf32>
    %27 = vector.extract_strided_slice %2 {offsets = [0, 20], sizes = [8, 4], strides = [1, 1]} : vector<8x36xf32> to vector<8x4xf32>
    %cst_16 = arith.constant dense<0.000000e+00> : vector<8x381xf32>
    %28 = tpu.matmul %27, %26, %cst_16 {dimension_numbers = #tpu.dot_dimension_numbers<[1], [0], [0], [1], [0, 0, 1, 1], [], []>} : vector<8x4xf32>, vector<4x381xf32>, vector<8x381xf32> -> vector<8x381xf32>
    %29 = arith.addf %25, %28 : vector<8x381xf32>
    %30 = vector.extract_strided_slice %1 {offsets = [0, 36], sizes = [4, 381], strides = [1, 1]} : vector<4x419xf32> to vector<4x381xf32>
    %31 = vector.extract_strided_slice %2 {offsets = [0, 24], sizes = [8, 4], strides = [1, 1]} : vector<8x36xf32> to vector<8x4xf32>
    %cst_17 = arith.constant dense<0.000000e+00> : vector<8x381xf32>
    %32 = tpu.matmul %31, %30, %cst_17 {dimension_numbers = #tpu.dot_dimension_numbers<[1], [0], [0], [1], [0, 0, 1, 1], [], []>} : vector<8x4xf32>, vector<4x381xf32>, vector<8x381xf32> -> vector<8x381xf32>
    %33 = arith.addf %29, %32 : vector<8x381xf32>
    %34 = vector.extract_strided_slice %1 {offsets = [0, 37], sizes = [4, 381], strides = [1, 1]} : vector<4x419xf32> to vector<4x381xf32>
    %35 = vector.extract_strided_slice %2 {offsets = [0, 28], sizes = [8, 4], strides = [1, 1]} : vector<8x36xf32> to vector<8x4xf32>
    %cst_18 = arith.constant dense<0.000000e+00> : vector<8x381xf32>
    %36 = tpu.matmul %35, %34, %cst_18 {dimension_numbers = #tpu.dot_dimension_numbers<[1], [0], [0], [1], [0, 0, 1, 1], [], []>} : vector<8x4xf32>, vector<4x381xf32>, vector<8x381xf32> -> vector<8x381xf32>
    %37 = arith.addf %33, %36 : vector<8x381xf32>
    %38 = vector.extract_strided_slice %1 {offsets = [0, 38], sizes = [4, 381], strides = [1, 1]} : vector<4x419xf32> to vector<4x381xf32>
    %39 = vector.extract_strided_slice %2 {offsets = [0, 32], sizes = [8, 4], strides = [1, 1]} : vector<8x36xf32> to vector<8x4xf32>
    %cst_19 = arith.constant dense<0.000000e+00> : vector<8x381xf32>
    %40 = tpu.matmul %39, %38, %cst_19 {dimension_numbers = #tpu.dot_dimension_numbers<[1], [0], [0], [1], [0, 0, 1, 1], [], []>} : vector<8x4xf32>, vector<4x381xf32>, vector<8x381xf32> -> vector<8x381xf32>
    %41 = arith.addf %37, %40 : vector<8x381xf32>
    %42 = vector.broadcast %5 : vector<8x1xf32> to vector<8x381xf32>
    %43 = arith.addf %41, %42 : vector<8x381xf32>
    %44 = vector.broadcast %6 : vector<1x381xf32> to vector<8x381xf32>
    %45 = arith.mulf %43, %44 : vector<8x381xf32>
    %c0_20 = arith.constant 0 : index
    %c0_21 = arith.constant 0 : index
    %46 = vector.load %arg6[%c0_20, %c0_21] : memref<8x1xf32, #tpu.memory_space<vmem>>, vector<8x1xf32>
    %c0_22 = arith.constant 0 : index
    %c0_23 = arith.constant 0 : index
    %47 = vector.load %arg7[%c0_22, %c0_23] : memref<1x343xf32, #tpu.memory_space<vmem>>, vector<1x343xf32>
    %48 = vector.extract_strided_slice %45 {offsets = [0, 0], sizes = [8, 343], strides = [1, 1]} : vector<8x381xf32> to vector<8x343xf32>
    %49 = vector.extract_strided_slice %3 {offsets = [0, 0], sizes = [8, 8], strides = [1, 1]} : vector<8x72xf32> to vector<8x8xf32>
    %cst_24 = arith.constant dense<0.000000e+00> : vector<8x343xf32>
    %50 = tpu.matmul %49, %48, %cst_24 {dimension_numbers = #tpu.dot_dimension_numbers<[1], [0], [0], [1], [0, 0, 1, 1], [], []>} : vector<8x8xf32>, vector<8x343xf32>, vector<8x343xf32> -> vector<8x343xf32>
    %51 = vector.extract_strided_slice %45 {offsets = [0, 1], sizes = [8, 343], strides = [1, 1]} : vector<8x381xf32> to vector<8x343xf32>
    %52 = vector.extract_strided_slice %3 {offsets = [0, 8], sizes = [8, 8], strides = [1, 1]} : vector<8x72xf32> to vector<8x8xf32>
    %cst_25 = arith.constant dense<0.000000e+00> : vector<8x343xf32>
    %53 = tpu.matmul %52, %51, %cst_25 {dimension_numbers = #tpu.dot_dimension_numbers<[1], [0], [0], [1], [0, 0, 1, 1], [], []>} : vector<8x8xf32>, vector<8x343xf32>, vector<8x343xf32> -> vector<8x343xf32>
    %54 = arith.addf %50, %53 : vector<8x343xf32>
    %55 = vector.extract_strided_slice %45 {offsets = [0, 2], sizes = [8, 343], strides = [1, 1]} : vector<8x381xf32> to vector<8x343xf32>
    %56 = vector.extract_strided_slice %3 {offsets = [0, 16], sizes = [8, 8], strides = [1, 1]} : vector<8x72xf32> to vector<8x8xf32>
    %cst_26 = arith.constant dense<0.000000e+00> : vector<8x343xf32>
    %57 = tpu.matmul %56, %55, %cst_26 {dimension_numbers = #tpu.dot_dimension_numbers<[1], [0], [0], [1], [0, 0, 1, 1], [], []>} : vector<8x8xf32>, vector<8x343xf32>, vector<8x343xf32> -> vector<8x343xf32>
    %58 = arith.addf %54, %57 : vector<8x343xf32>
    %59 = vector.extract_strided_slice %45 {offsets = [0, 18], sizes = [8, 343], strides = [1, 1]} : vector<8x381xf32> to vector<8x343xf32>
    %60 = vector.extract_strided_slice %3 {offsets = [0, 24], sizes = [8, 8], strides = [1, 1]} : vector<8x72xf32> to vector<8x8xf32>
    %cst_27 = arith.constant dense<0.000000e+00> : vector<8x343xf32>
    %61 = tpu.matmul %60, %59, %cst_27 {dimension_numbers = #tpu.dot_dimension_numbers<[1], [0], [0], [1], [0, 0, 1, 1], [], []>} : vector<8x8xf32>, vector<8x343xf32>, vector<8x343xf32> -> vector<8x343xf32>
    %62 = arith.addf %58, %61 : vector<8x343xf32>
    %63 = vector.extract_strided_slice %45 {offsets = [0, 19], sizes = [8, 343], strides = [1, 1]} : vector<8x381xf32> to vector<8x343xf32>
    %64 = vector.extract_strided_slice %3 {offsets = [0, 32], sizes = [8, 8], strides = [1, 1]} : vector<8x72xf32> to vector<8x8xf32>
    %cst_28 = arith.constant dense<0.000000e+00> : vector<8x343xf32>
    %65 = tpu.matmul %64, %63, %cst_28 {dimension_numbers = #tpu.dot_dimension_numbers<[1], [0], [0], [1], [0, 0, 1, 1], [], []>} : vector<8x8xf32>, vector<8x343xf32>, vector<8x343xf32> -> vector<8x343xf32>
    %66 = arith.addf %62, %65 : vector<8x343xf32>
    %67 = vector.extract_strided_slice %45 {offsets = [0, 20], sizes = [8, 343], strides = [1, 1]} : vector<8x381xf32> to vector<8x343xf32>
    %68 = vector.extract_strided_slice %3 {offsets = [0, 40], sizes = [8, 8], strides = [1, 1]} : vector<8x72xf32> to vector<8x8xf32>
    %cst_29 = arith.constant dense<0.000000e+00> : vector<8x343xf32>
    %69 = tpu.matmul %68, %67, %cst_29 {dimension_numbers = #tpu.dot_dimension_numbers<[1], [0], [0], [1], [0, 0, 1, 1], [], []>} : vector<8x8xf32>, vector<8x343xf32>, vector<8x343xf32> -> vector<8x343xf32>
    %70 = arith.addf %66, %69 : vector<8x343xf32>
    %71 = vector.extract_strided_slice %45 {offsets = [0, 36], sizes = [8, 343], strides = [1, 1]} : vector<8x381xf32> to vector<8x343xf32>
    %72 = vector.extract_strided_slice %3 {offsets = [0, 48], sizes = [8, 8], strides = [1, 1]} : vector<8x72xf32> to vector<8x8xf32>
    %cst_30 = arith.constant dense<0.000000e+00> : vector<8x343xf32>
    %73 = tpu.matmul %72, %71, %cst_30 {dimension_numbers = #tpu.dot_dimension_numbers<[1], [0], [0], [1], [0, 0, 1, 1], [], []>} : vector<8x8xf32>, vector<8x343xf32>, vector<8x343xf32> -> vector<8x343xf32>
    %74 = arith.addf %70, %73 : vector<8x343xf32>
    %75 = vector.extract_strided_slice %45 {offsets = [0, 37], sizes = [8, 343], strides = [1, 1]} : vector<8x381xf32> to vector<8x343xf32>
    %76 = vector.extract_strided_slice %3 {offsets = [0, 56], sizes = [8, 8], strides = [1, 1]} : vector<8x72xf32> to vector<8x8xf32>
    %cst_31 = arith.constant dense<0.000000e+00> : vector<8x343xf32>
    %77 = tpu.matmul %76, %75, %cst_31 {dimension_numbers = #tpu.dot_dimension_numbers<[1], [0], [0], [1], [0, 0, 1, 1], [], []>} : vector<8x8xf32>, vector<8x343xf32>, vector<8x343xf32> -> vector<8x343xf32>
    %78 = arith.addf %74, %77 : vector<8x343xf32>
    %79 = vector.extract_strided_slice %45 {offsets = [0, 38], sizes = [8, 343], strides = [1, 1]} : vector<8x381xf32> to vector<8x343xf32>
    %80 = vector.extract_strided_slice %3 {offsets = [0, 64], sizes = [8, 8], strides = [1, 1]} : vector<8x72xf32> to vector<8x8xf32>
    %cst_32 = arith.constant dense<0.000000e+00> : vector<8x343xf32>
    %81 = tpu.matmul %80, %79, %cst_32 {dimension_numbers = #tpu.dot_dimension_numbers<[1], [0], [0], [1], [0, 0, 1, 1], [], []>} : vector<8x8xf32>, vector<8x343xf32>, vector<8x343xf32> -> vector<8x343xf32>
    %82 = arith.addf %78, %81 : vector<8x343xf32>
    %83 = vector.broadcast %46 : vector<8x1xf32> to vector<8x343xf32>
    %84 = arith.addf %82, %83 : vector<8x343xf32>
    %85 = vector.broadcast %47 : vector<1x343xf32> to vector<8x343xf32>
    %86 = arith.mulf %84, %85 : vector<8x343xf32>
    %87 = vector.extract_strided_slice %86 {offsets = [0, 0], sizes = [8, 324], strides = [1, 1]} : vector<8x343xf32> to vector<8x324xf32>
    %88 = vector.extract_strided_slice %4 {offsets = [0, 0], sizes = [16, 8], strides = [1, 1]} : vector<16x32xf32> to vector<16x8xf32>
    %cst_33 = arith.constant dense<0.000000e+00> : vector<16x324xf32>
    %89 = tpu.matmul %88, %87, %cst_33 {dimension_numbers = #tpu.dot_dimension_numbers<[1], [0], [0], [1], [0, 0, 1, 1], [], []>} : vector<16x8xf32>, vector<8x324xf32>, vector<16x324xf32> -> vector<16x324xf32>
    %90 = vector.extract_strided_slice %86 {offsets = [0, 1], sizes = [8, 324], strides = [1, 1]} : vector<8x343xf32> to vector<8x324xf32>
    %91 = vector.extract_strided_slice %4 {offsets = [0, 8], sizes = [16, 8], strides = [1, 1]} : vector<16x32xf32> to vector<16x8xf32>
    %cst_34 = arith.constant dense<0.000000e+00> : vector<16x324xf32>
    %92 = tpu.matmul %91, %90, %cst_34 {dimension_numbers = #tpu.dot_dimension_numbers<[1], [0], [0], [1], [0, 0, 1, 1], [], []>} : vector<16x8xf32>, vector<8x324xf32>, vector<16x324xf32> -> vector<16x324xf32>
    %93 = arith.addf %89, %92 : vector<16x324xf32>
    %94 = vector.extract_strided_slice %86 {offsets = [0, 18], sizes = [8, 324], strides = [1, 1]} : vector<8x343xf32> to vector<8x324xf32>
    %95 = vector.extract_strided_slice %4 {offsets = [0, 16], sizes = [16, 8], strides = [1, 1]} : vector<16x32xf32> to vector<16x8xf32>
    %cst_35 = arith.constant dense<0.000000e+00> : vector<16x324xf32>
    %96 = tpu.matmul %95, %94, %cst_35 {dimension_numbers = #tpu.dot_dimension_numbers<[1], [0], [0], [1], [0, 0, 1, 1], [], []>} : vector<16x8xf32>, vector<8x324xf32>, vector<16x324xf32> -> vector<16x324xf32>
    %97 = arith.addf %93, %96 : vector<16x324xf32>
    %98 = vector.extract_strided_slice %86 {offsets = [0, 19], sizes = [8, 324], strides = [1, 1]} : vector<8x343xf32> to vector<8x324xf32>
    %99 = vector.extract_strided_slice %4 {offsets = [0, 24], sizes = [16, 8], strides = [1, 1]} : vector<16x32xf32> to vector<16x8xf32>
    %cst_36 = arith.constant dense<0.000000e+00> : vector<16x324xf32>
    %100 = tpu.matmul %99, %98, %cst_36 {dimension_numbers = #tpu.dot_dimension_numbers<[1], [0], [0], [1], [0, 0, 1, 1], [], []>} : vector<16x8xf32>, vector<8x324xf32>, vector<16x324xf32> -> vector<16x324xf32>
    %101 = arith.addf %97, %100 : vector<16x324xf32>
    %c0_37 = arith.constant 0 : index
    %c0_38 = arith.constant 0 : index
    %102 = vector.load %arg9[%c0_37, %c0_38] : memref<16x1xf32, #tpu.memory_space<vmem>>, vector<16x1xf32>
    %103 = vector.broadcast %102 : vector<16x1xf32> to vector<16x324xf32>
    %104 = arith.addf %101, %103 : vector<16x324xf32>
    %c0_39 = arith.constant 0 : index
    %c0_40 = arith.constant 0 : index
    %c0_41 = arith.constant 0 : index
    %105 = vector.load %arg10[%c0_39, %c0_40, %c0_41] : memref<1x16x324xf32, #tpu.memory_space<vmem>>, vector<1x16x324xf32>
    %106 = vector.shape_cast %105 : vector<1x16x324xf32> to vector<16x324xf32>
    %107 = vector.shape_cast %104 : vector<16x324xf32> to vector<1x16x324xf32>
    tpu.vector_store %arg10[%c0_39, %c0_40, %c0_41], %107 {strides = array<i32>} : memref<1x16x324xf32, #tpu.memory_space<vmem>>, vector<1x16x324xf32>,
    return
  }
  func.func @transform_0(%arg0: i32) -> (i32, i32, i32) {
    %c0_i32 = arith.constant 0 : i32
    %c0_i32_0 = arith.constant 0 : i32
    %c0_i32_1 = arith.constant 0 : i32
    return %arg0, %c0_i32, %c0_i32_0 : i32, i32, i32
  }
  func.func @transform_1(%arg0: i32) -> (i32, i32) {
    %c0_i32 = arith.constant 0 : i32
    %c0_i32_0 = arith.constant 0 : i32
    %c0_i32_1 = arith.constant 0 : i32
    return %c0_i32, %c0_i32_0 : i32, i32
  }
  func.func @transform_2(%arg0: i32) -> (i32, i32) {
    %c0_i32 = arith.constant 0 : i32
    %c0_i32_0 = arith.constant 0 : i32
    %c0_i32_1 = arith.constant 0 : i32
    return %c0_i32, %c0_i32_0 : i32, i32
  }
  func.func @transform_3(%arg0: i32) -> (i32, i32) {
    %c0_i32 = arith.constant 0 : i32
    %c0_i32_0 = arith.constant 0 : i32
    %c0_i32_1 = arith.constant 0 : i32
    return %c0_i32, %c0_i32_0 : i32, i32
  }
  func.func @transform_4(%arg0: i32) -> (i32, i32) {
    %c0_i32 = arith.constant 0 : i32
    %c0_i32_0 = arith.constant 0 : i32
    %c0_i32_1 = arith.constant 0 : i32
    return %c0_i32, %c0_i32_0 : i32, i32
  }
  func.func @transform_5(%arg0: i32) -> (i32, i32) {
    %c0_i32 = arith.constant 0 : i32
    %c0_i32_0 = arith.constant 0 : i32
    %c0_i32_1 = arith.constant 0 : i32
    return %c0_i32, %c0_i32_0 : i32, i32
  }
  func.func @transform_6(%arg0: i32) -> (i32, i32) {
    %c0_i32 = arith.constant 0 : i32
    %c0_i32_0 = arith.constant 0 : i32
    %c0_i32_1 = arith.constant 0 : i32
    return %c0_i32, %c0_i32_0 : i32, i32
  }
  func.func @transform_7(%arg0: i32) -> (i32, i32) {
    %c0_i32 = arith.constant 0 : i32
    %c0_i32_0 = arith.constant 0 : i32
    %c0_i32_1 = arith.constant 0 : i32
    return %c0_i32, %c0_i32_0 : i32, i32
  }
  func.func @transform_8(%arg0: i32) -> (i32, i32) {
    %c0_i32 = arith.constant 0 : i32
    %c0_i32_0 = arith.constant 0 : i32
    %c0_i32_1 = arith.constant 0 : i32
    return %c0_i32, %c0_i32_0 : i32, i32
  }
  func.func @transform_9(%arg0: i32) -> (i32, i32, i32) {
    %c0_i32 = arith.constant 0 : i32
    %c0_i32_0 = arith.constant 0 : i32
    %c0_i32_1 = arith.constant 0 : i32
    return %arg0, %c0_i32, %c0_i32_0 : i32, i32, i32
  }
}

</mosaic_0001>

<bundles_post_ra>
// kernel: tile.8
= control target key start
LH: loop header
LB: loop body
LE: loop exit
PB: predicated region body
PF: predicated region fallthrough
CT: control target
= control target key end

     0   :  { %s22_s0 = inlined_call_operand.vmem [shape: f32[4], index: 0, kind: input, shape index: {}]   ;;  %s23_s1 = inlined_call_operand.vmem [shape: f32[4,4], index: 1, kind: output, shape index: {}]  }
   0x1   :  { %v4_v0 = vld [vmem:[%s22_s0] ss:$0 sm:$0xff] }
   0x2   :  { %5 = vst [vmem:[%s23_s1] sm:$0xf] %v4_v0 }

// kernel: tile.0
= control target key start
LH: loop header
LB: loop body
LE: loop exit
PB: predicated region body
PF: predicated region fallthrough
CT: control target
= control target key end

     0   :  { %s35_s8 = smov 125   ;;  %vm8_vm0 = vcmask 7168   ;;  %s36_s11 = smov 126   ;;  %s62_s0 = inlined_call_operand.vmem [shape: f32[4,4], index: 0, kind: input, shape index: {}]   ;;  %s63_s1 = inlined_call_operand.vmem [shape: f32[16,1], index: 1, kind: output, shape index: {}]  }
   0x1   :  { %v5_v0 = vld [vmem:[%s62_s0] sm:$0xf]  ;;  %s34_s0 = smov 127  }
   0x2   :  { %6 = vst [vmem:[#allocation0] sm:$0xf] %v5_v0 }
   0x9   :  { %v10_v1 = vld [vmem:[#allocation0] sm:$0xf]  }
   0xa   :  { %v22_v2 = vld [vmem:[#allocation0] sm:$0xf]   ;;  %11 = vrot.lane.b32.xlu0 %v10_v1, %s34_s0 }
   0xb   :  { %23 = vrot.lane.b32.xlu1 %v22_v2, %s35_s8  ;;  %v7_v3 = vld [vmem:[#allocation0] sm:$0xf]  }
   0xc   :  { %v16_v4 = vld [vmem:[#allocation0] sm:$0xf]   ;;  %9 = vst.msk [vmem:[%s63_s1] ss:$4 sm:$0xf] %vm8_vm0, %v7_v3  }
   0xe   :  { %17 = vrot.lane.b32.xlu0 %v16_v4, %s36_s11 }
  0x7c   :  { %v12_v5 = vpop.permute.xlu0 %11  }
  0x7d   :  { %v24_v6 = vpop.permute.xlu1 %23   ;;  %28 = vst.msk [vmem:[%s63_s1 + $0x1] ss:$4 sm:$0xf] %vm8_vm0, %v12_v5  }
  0x7e   :  { %30 = vst.msk [vmem:[%s63_s1 + $0x3] ss:$4 sm:$0xf] %vm8_vm0, %v24_v6  }
  0x80   :  { %v18_v7 = vpop.permute.xlu0 %17  }
  0x81   :  { %29 = vst.msk [vmem:[%s63_s1 + $0x2] ss:$4 sm:$0xf] %vm8_vm0, %v18_v7  }

// kernel: upsample_forward.1
= control target key start
LH: loop header
LB: loop body
LE: loop exit
PB: predicated region body
PF: predicated region fallthrough
CT: control target
= control target key end

     0   :  { %s4418_s30 = smov 0   ;;  %s4865_s0 = inlined_call_operand.vmem [shape: f32[2,4,419], index: 0, kind: input, shape index: {}]   ;;  %s4866_s1 = inlined_call_operand.vmem [shape: f32[8,36], index: 1, kind: input, shape index: {}]   ;;  %s4867_s2 = inlined_call_operand.vmem [shape: f32[8,1], index: 2, kind: input, shape index: {}]   ;;  %s4868_s3 = inlined_call_operand.vmem [shape: f32[1,381], index: 3, kind: input, shape index: {}]   ;;  %s4869_s4 = inlined_call_operand.vmem [shape: f32[8,72], index: 4, kind: input, shape index: {}]   ;;  %s4870_s5 = inlined_call_operand.vmem [shape: f32[8,1], index: 5, kind: input, shape index: {}]   ;;  %s4871_s6 = inlined_call_operand.vmem [shape: f32[1,343], index: 6, kind: input, shape index: {}]   ;;  %s4872_s7 = inlined_call_operand.vmem [shape: f32[16,32], index: 7, kind: input, shape index: {}]   ;;  %s4873_s8 = inlined_call_operand.vmem [shape: f32[16,1], index: 8, kind: input, shape index: {}]   ;;  %s4874_s9 = inlined_call_operand.vmem [shape: f32[2,16,324], index: 9, kind: output, shape index: {}]  }
   0x1 LB: > { %s4055_s10 = sadd.s32 4294967295, %s4344_s30   ;;  %p4059_p0 = scmp.ge.s32.totalorder %s4344_s30, 1  ;;  %s4344_s30 = sphi %s4418_s30, %s19_s30  }
   0x2   : > { %p287_p1 = scmp.lt.s32.totalorder %s4344_s30, 3 }
   0x4   : > { %p288_p2 = pnand %p4059_p0, %p287_p1 }
   0x5   : > { %p323_p3 = scmp.lt.s32.totalorder (!%p288_p2), %s4055_s10, 1  ;;  %s4346_s13 = smov (!%p288_p2), 124  }
   0x6   : > { %291 = sbr.rel (%p288_p2) target bundleno = 1118 (0x45e), region = 56  ;;  %s4349_s18 = smov (!%p288_p2), 127  }
   0x7   : > { %s4350_s19 = smov (!%p288_p2), 126   ;;  %s4351_s20 = smov (!%p288_p2), 120  }
   0x8   : > { %s4352_s21 = smov (!%p288_p2), 110   ;;  %s4353_s22 = smov (!%p288_p2), 116  }
   0x9   : > { %s4354_s23 = smov (!%p288_p2), 109   ;;  %s4355_s24 = smov (!%p288_p2), 108  }
   0xa   : > { %s4356_s25 = smov (!%p288_p2), 112   ;;  %s4357_s26 = smov (!%p288_p2), 92  }
   0xb   : > { %v4429_v0 = vld [vmem:[%s4866_s1] sm:$0xff]  ;;  %v4347_v1 = vmov 0.0   ;;  %s4876_s10 = smov (!%p323_p3, %s4055_s10), 1  ;;  %vm4348_vm0 = vmmov 0   ;;  %s4358_s27 = smov 91   ;;  %v4362_v6 = vmov 0  }
   0xc   : > { %342 = vrot.lane.b32.xlu1 %v4429_v0, %s4346_s13  ;;  %4193 = vmatprep.subr.mxu1 %v4347_v1  ;;  %s4144_s14 = sshll.u32 %s4876_s10, 4  ;;  %s4359_s28 = smov 104   ;;  %v339_v7 = vld [vmem:[%s4867_s2] sm:$0xff]  ;;  %vm359_vm1 = vcmask 1043456   ;;  %vm356_vm2 = vcmask 31744   ;;  %vm353_vm3 = vcmask 1039360  }
   0xd   : > { %4195 = vmatprep.mubr.msk.f32.mxu1 %vm4348_vm0, %v4347_v1  ;;  %430 = vmatprep.mubr.f32.mxu0 %v4347_v1  ;;  %s327_s17 = scalar_lea.vmem %s4865_s0, %s4144_s14  ;;  %s4360_s29 = smov 100   ;;  %vm664_vm4 = vcmask 1031168   ;;  %vm830_vm5 = vcmask 900096   ;;  %vm996_vm6 = vcmask 891904   ;;  %vm1162_vm7 = vcmask 883712  }
   0xe   : > { %v4442_v2 = vld [vmem:[%s327_s17 + $0x8] sm:$0xff]  ;;  %v4444_v3 = vld [vmem:[%s327_s17] sm:$0xff]  ;;  %s4361_s11 = smov 90   ;;  %4334 = vset.pattern.permute.xlu0 %v4362_v6  ;;  %4335 = vset.pattern.permute.xlu1 %v4362_v6  ;;  %s4363_s12 = smov 96   ;;  %vm1328_vm8 = vcmask 752640   ;;  %vm1494_vm9 = vcmask 744448  }
   0xf   : > { %351 = vrot.lane.b32.xlu0 %v4442_v2, %s4349_s18  ;;  %v4452_v4 = vcombine.high %v4444_v3, %v4444_v3  ;;  %v821_v5 = vcombine.high %v4442_v2, %v4442_v2  ;;  %vm1660_vm10 = vcmask 736256   ;;  %s4366_s13 = smov 72   ;;  %vm1862_vm11 = vcmask 64512  }
  0x10   : > { %347 = vrot.lane.b32.xlu1 %v4444_v3, %s4349_s18  ;;  %vm3995_vm12 = vcmask 556032  }
  0x13   : > { %349 = vrot.lane.b32.xlu0 %v4452_v4, %s4349_s18 }
  0x14   : > { %662 = vrot.lane.b32.xlu1 %v4442_v2, %s4350_s19 }
  0x17   : > { %660 = vrot.lane.b32.xlu0 %v4452_v4, %s4350_s19 }
  0x18   : > { %656 = vrot.lane.b32.xlu1 %v4429_v0, %s4351_s20 }
  0x1b   : > { %658 = vrot.lane.b32.xlu0 %v4444_v3, %s4350_s19 }
  0x1c   : > { %826 = vrot.lane.b32.xlu1 %v4442_v2, %s4352_s21 }
  0x1f   : > { %824 = vrot.lane.b32.xlu0 %v4452_v4, %s4352_s21 }
  0x20   : > { %819 = vrot.lane.b32.xlu1 %v4429_v0, %s4353_s22 }
  0x23   : > { %822 = vrot.lane.b32.xlu0 %v4444_v3, %s4352_s21 }
  0x24   : > { %990 = vrot.lane.b32.xlu1 %v4452_v4, %s4354_s23 }
  0x27   : > { %828 = vrot.lane.b32.xlu0 %v821_v5, %s4352_s21 }
  0x28   : > { %988 = vrot.lane.b32.xlu1 %v4444_v3, %s4354_s23 }
  0x2b   : > { %992 = vrot.lane.b32.xlu0 %v4442_v2, %s4354_s23 }
  0x2c   : > { %994 = vrot.lane.b32.xlu1 %v821_v5, %s4354_s23 }
  0x2f   : > { %986 = vrot.lane.b32.xlu0 %v4429_v0, %s4356_s25 }
  0x30   : > { %1158 = vrot.lane.b32.xlu1 %v4442_v2, %s4355_s24 }
  0x33   : > { %1156 = vrot.lane.b32.xlu0 %v4452_v4, %s4355_s24 }
  0x34   : > { %1152 = vrot.lane.b32.xlu1 %v4429_v0, %s4355_s24 }
  0x37   : > { %1154 = vrot.lane.b32.xlu0 %v4444_v3, %s4355_s24 }
  0x38   : > { %1322 = vrot.lane.b32.xlu1 %v4452_v4, %s4357_s26 }
  0x3b   : > { %1160 = vrot.lane.b32.xlu0 %v821_v5, %s4355_s24 }
  0x3c   : > { %1320 = vrot.lane.b32.xlu1 %v4444_v3, %s4357_s26 }
  0x3f   : > { %1324 = vrot.lane.b32.xlu0 %v4442_v2, %s4357_s26 }
  0x40   : > { %1326 = vrot.lane.b32.xlu1 %v821_v5, %s4357_s26 }
  0x43   : > { %1318 = vrot.lane.b32.xlu0 %v4429_v0, %s4359_s28 }
  0x44   : > { %1490 = vrot.lane.b32.xlu1 %v4442_v2, %s4358_s27 }
  0x47   : > { %1488 = vrot.lane.b32.xlu0 %v4452_v4, %s4358_s27 }
  0x48   : > { %1484 = vrot.lane.b32.xlu1 %v4429_v0, %s4360_s29  ;;  %s4364_s29 = smov 88  }
  0x4b   : > { %1486 = vrot.lane.b32.xlu0 %v4444_v3, %s4358_s27 }
  0x4c   : > { %1654 = vrot.lane.b32.xlu1 %v4452_v4, %s4361_s11 }
  0x4f   : > { %1492 = vrot.lane.b32.xlu0 %v821_v5, %s4358_s27 }
  0x50   : > { %1652 = vrot.lane.b32.xlu1 %v4444_v3, %s4361_s11 }
  0x53   : > { %1656 = vrot.lane.b32.xlu0 %v4442_v2, %s4361_s11 }
  0x54   : > { %1658 = vrot.lane.b32.xlu1 %v821_v5, %s4361_s11  ;;  %v4632_v5 = vld [vmem:[%s4869_s4] sm:$0xff] }
  0x57   : > { %1650 = vrot.lane.b32.xlu0 %v4429_v0, %s4363_s12 }
  0x58   : > { %1846 = vrot.lane.b32.xlu1 %v4632_v5, %s4351_s20 }
  0x5b   : > { %1818 = vperm.xlu0 %4334, %v339_v7  }
  0x5c   : > { %2149 = vrot.lane.b32.xlu1 %v4632_v5, %s4356_s25 }
  0x60   : > { %2308 = vrot.lane.b32.xlu1 %v4632_v5, %s4359_s28 }
  0x7e   : > { %v343_v8 = vpop.permute.xlu1 %342 }
  0x81   : > { %v352_v9 = vpop.permute.xlu0 %351 }
  0x82   : > { %v348_v10 = vpop.permute.xlu1 %347  ;;  %4194 = vmatpush3.msk.msra.mxu1 %vm359_vm1, %v352_v9 }
  0x83   : > { %4196 = vmatmul.mubr.msk.f32.vlgmr.msra.gmra.mxu1 %vm356_vm2, %v343_v8  ;;  %4198 = vmatprep.subr.mxu1 %v4347_v1 }
  0x84   : > { %4199 = vmatpush3.msk.msra.mxu1 %vm359_vm1, %v4442_v2  ;;  %4200 = vmatprep.mubr.msk.f32.mxu1 %vm4348_vm0, %v4347_v1 }
  0x85   : > { %v350_v12 = vpop.permute.xlu0 %349  ;;  %4203 = vmatprep.subr.mxu1 %v4347_v1 }
  0x86   : > { %v663_v11 = vpop.permute.xlu1 %662  ;;  %v355_v13 = vsel %vm353_vm3, %v350_v12, %v352_v9  ;;  %v354_v14 = vsel %vm353_vm3, %v348_v10, %v350_v12 }
  0x87   : > { %4063 = vmatprep.subr.msk.mxu0 %vm359_vm1, %v355_v13  ;;  %4201 = vmatmul.mubr.msk.f32.vlgmr.msra.gmra.mxu1 %vm356_vm2, %v4429_v0 }
  0x88   : > { %4064 = vmatpush1.msk.msra.mxu0 %vm359_vm1, %v354_v14  ;;  %4204 = vmatpush3.msk.msra.mxu1 %vm359_vm1, %v663_v11 }
  0x89   : > { %4065 = vmatmul.mubr.msk.f32.vlgmr.msra.gmra.mxu0 %vm356_vm2, %v343_v8  ;;  %4068 = vmatprep.subr.msk.mxu0 %vm359_vm1, %v4452_v4  ;;  %v661_v16 = vpop.permute.xlu0 %660 }
  0x8a   : > { %v657_v15 = vpop.permute.xlu1 %656  ;;  %v666_v17 = vsel %vm664_vm4, %v661_v16, %v663_v11  ;;  %4069 = vmatpush1.msk.msra.mxu0 %vm359_vm1, %v4444_v3  ;;  %4205 = vmatprep.mubr.msk.f32.mxu1 %vm4348_vm0, %v4347_v1 }
  0x8b   : > { %4073 = vmatprep.subr.msk.mxu0 %vm359_vm1, %v666_v17  ;;  %4206 = vmatmul.mubr.msk.f32.vlgmr.msra.gmra.mxu1 %vm356_vm2, %v657_v15 }
  0x8c   : > { %579 = vmatprep.mubr.f32.mxu0 %v4347_v1  ;;  %4208 = vmatprep.subr.mxu1 %v4347_v1 }
  0x8d   : > { %4070 = vmatmul.mubr.msk.f32.vlgmr.msra.gmra.mxu0 %vm356_vm2, %v4429_v0  ;;  %v659_v19 = vpop.permute.xlu0 %658  ;;  %4210 = vmatprep.mubr.msk.f32.mxu1 %vm4348_vm0, %v4347_v1 }
  0x8e   : > { %v827_v18 = vpop.permute.xlu1 %826  ;;  %v665_v20 = vsel %vm664_vm4, %v659_v19, %v661_v16  ;;  %739 = vmatprep.mubr.f32.mxu0 %v4347_v1 }
  0x8f   : > { %4074 = vmatpush1.msk.msra.mxu0 %vm359_vm1, %v665_v20 }
  0x91   : > { %4075 = vmatmul.mubr.msk.f32.vlgmr.msra.gmra.mxu0 %vm356_vm2, %v657_v15  ;;  %v825_v22 = vpop.permute.xlu0 %824 }
  0x92   : > { %v820_v21 = vpop.permute.xlu1 %819  ;;  %v832_v23 = vsel %vm830_vm5, %v825_v22, %v827_v18  ;;  %906 = vmatprep.mubr.f32.mxu0 %v4347_v1 }
  0x93   : > { %4078 = vmatprep.subr.msk.mxu0 %vm359_vm1, %v832_v23 }
  0x95   : > { %v823_v25 = vpop.permute.xlu0 %822 }
  0x96   : > { %v991_v24 = vpop.permute.xlu1 %990  ;;  %v831_v26 = vsel %vm830_vm5, %v823_v25, %v825_v22 }
  0x97   : > { %4079 = vmatpush1.msk.msra.mxu0 %vm359_vm1, %v831_v26 }
  0x98   : > { %4080 = vmatmul.mubr.msk.f32.vlgmr.msra.gmra.mxu0 %vm356_vm2, %v820_v21 }
  0x99   : > { %v829_v28 = vpop.permute.xlu0 %828  ;;  %1072 = vmatprep.mubr.f32.mxu0 %v4347_v1 }
  0x9a   : > { %v989_v27 = vpop.permute.xlu1 %988  ;;  %v833_v29 = vsel %vm830_vm5, %v827_v18, %v829_v28 }
  0x9b   : > { %4209 = vmatpush3.msk.msra.mxu1 %vm359_vm1, %v833_v29  ;;  %v997_v34 = vsel %vm996_vm6, %v989_v27, %v991_v24 }
  0x9c   : > { %4211 = vmatmul.mubr.msk.f32.vlgmr.msra.gmra.mxu1 %vm356_vm2, %v820_v21  ;;  %4213 = vmatprep.subr.mxu1 %v4347_v1 }
  0x9d   : > { %v993_v31 = vpop.permute.xlu0 %992  ;;  %4215 = vmatprep.mubr.msk.f32.mxu1 %vm4348_vm0, %v4347_v1 }
  0x9e   : > { %v995_v30 = vpop.permute.xlu1 %994  ;;  %v998_v32 = vsel %vm996_vm6, %v991_v24, %v993_v31 }
  0x9f   : > { %v999_v33 = vsel %vm996_vm6, %v993_v31, %v995_v30  ;;  %4083 = vmatprep.subr.msk.mxu0 %vm359_vm1, %v998_v32 }
  0xa0   : > { %4214 = vmatpush3.msk.msra.mxu1 %vm359_vm1, %v999_v33  ;;  %4084 = vmatpush1.msk.msra.mxu0 %vm359_vm1, %v997_v34 }
  0xa1   : > { %4218 = vmatprep.subr.mxu1 %v4347_v1  ;;  %v987_v36 = vpop.permute.xlu0 %986 }
  0xa2   : > { %v1159_v35 = vpop.permute.xlu1 %1158  ;;  %4085 = vmatmul.mubr.msk.f32.vlgmr.msra.gmra.mxu0 %vm356_vm2, %v987_v36  ;;  %4216 = vmatmul.mubr.msk.f32.vlgmr.msra.gmra.mxu1 %vm356_vm2, %v987_v36 }
  0xa3   : > { %1238 = vmatprep.mubr.f32.mxu0 %v4347_v1  ;;  %4220 = vmatprep.mubr.msk.f32.mxu1 %vm4348_vm0, %v4347_v1 }
  0xa5   : > { %v1157_v38 = vpop.permute.xlu0 %1156 }
  0xa6   : > { %v1153_v37 = vpop.permute.xlu1 %1152  ;;  %v1164_v39 = vsel %vm1162_vm7, %v1157_v38, %v1159_v35 }
  0xa7   : > { %4088 = vmatprep.subr.msk.mxu0 %vm359_vm1, %v1164_v39 }
  0xa9   : > { %v1155_v41 = vpop.permute.xlu0 %1154 }
  0xaa   : > { %v1323_v40 = vpop.permute.xlu1 %1322  ;;  %v1163_v42 = vsel %vm1162_vm7, %v1155_v41, %v1157_v38 }
  0xab   : > { %4089 = vmatpush1.msk.msra.mxu0 %vm359_vm1, %v1163_v42 }
  0xac   : > { %4090 = vmatmul.mubr.msk.f32.vlgmr.msra.gmra.mxu0 %vm356_vm2, %v1153_v37 }
  0xad   : > { %v1161_v44 = vpop.permute.xlu0 %1160  ;;  %1404 = vmatprep.mubr.f32.mxu0 %v4347_v1 }
  0xae   : > { %v1321_v43 = vpop.permute.xlu1 %1320  ;;  %v1165_v45 = vsel %vm1162_vm7, %v1159_v35, %v1161_v44  ;;  %v1825_v35 = vlaneseq }
  0xaf   : > { %4219 = vmatpush3.msk.msra.mxu1 %vm359_vm1, %v1165_v45  ;;  %v1329_v50 = vsel %vm1328_vm8, %v1321_v43, %v1323_v40 }
  0xb0   : > { %4221 = vmatmul.mubr.msk.f32.vlgmr.msra.gmra.mxu1 %vm356_vm2, %v1153_v37  ;;  %4223 = vmatprep.subr.mxu1 %v4347_v1  ;;  %v4640_v41 = vshrl.u32 %v1825_v35, 7 }
  0xb1   : > { %v1325_v47 = vpop.permute.xlu0 %1324  ;;  %4225 = vmatprep.mubr.msk.f32.mxu1 %vm4348_vm0, %v4347_v1 }
  0xb2   : > { %v1327_v46 = vpop.permute.xlu1 %1326  ;;  %v1330_v48 = vsel %vm1328_vm8, %v1323_v40, %v1325_v47 }
  0xb3   : > { %v1331_v49 = vsel %vm1328_vm8, %v1325_v47, %v1327_v46  ;;  %4093 = vmatprep.subr.msk.mxu0 %vm359_vm1, %v1330_v48 }
  0xb4   : > { %4224 = vmatpush3.msk.msra.mxu1 %vm359_vm1, %v1331_v49  ;;  %4094 = vmatpush1.msk.msra.mxu0 %vm359_vm1, %v1329_v50  ;;  %v1827_v49 = vsub.s32 0, %v4640_v41 }
  0xb5   : > { %4228 = vmatprep.subr.mxu1 %v4347_v1  ;;  %v1319_v52 = vpop.permute.xlu0 %1318 }
  0xb6   : > { %v1491_v51 = vpop.permute.xlu1 %1490  ;;  %4095 = vmatmul.mubr.msk.f32.vlgmr.msra.gmra.mxu0 %vm356_vm2, %v1319_v52  ;;  %4226 = vmatmul.mubr.msk.f32.vlgmr.msra.gmra.mxu1 %vm356_vm2, %v1319_v52  ;;  %v340_v52 = vld [vmem:[%s4868_s3] sm:$0x7] }
  0xb7   : > { %1570 = vmatprep.mubr.f32.mxu0 %v4347_v1  ;;  %4230 = vmatprep.mubr.msk.f32.mxu1 %vm4348_vm0, %v4347_v1 }
  0xb9   : > { %v1489_v54 = vpop.permute.xlu0 %1488 }
  0xba   : > { %v1485_v53 = vpop.permute.xlu1 %1484  ;;  %v1496_v55 = vsel %vm1494_vm9, %v1489_v54, %v1491_v51 }
  0xbb   : > { %4098 = vmatprep.subr.msk.mxu0 %vm359_vm1, %v1496_v55 }
  0xbd   : > { %v1487_v57 = vpop.permute.xlu0 %1486 }
  0xbe   : > { %v1655_v56 = vpop.permute.xlu1 %1654  ;;  %v1495_v58 = vsel %vm1494_vm9, %v1487_v57, %v1489_v54 }
  0xbf   : > { %4099 = vmatpush1.msk.msra.mxu0 %vm359_vm1, %v1495_v58 }
  0xc0   : > { %4100 = vmatmul.mubr.msk.f32.vlgmr.msra.gmra.mxu0 %vm356_vm2, %v1485_v53 }
  0xc1   : > { %v1493_v60 = vpop.permute.xlu0 %1492  ;;  %1736 = vmatprep.mubr.f32.mxu0 %v4347_v1 }
  0xc2   : > { %v1653_v59 = vpop.permute.xlu1 %1652  ;;  %v1497_v61 = vsel %vm1494_vm9, %v1491_v51, %v1493_v60 }
  0xc3   : > { %4229 = vmatpush3.msk.msra.mxu1 %vm359_vm1, %v1497_v61  ;;  %v1661_v3 = vsel %vm1660_vm10, %v1653_v59, %v1655_v56  ;;  %v1828_v61 = vrot.slane %v340_v52, %v1827_v49 }
  0xc4   : > { %4231 = vmatmul.mubr.msk.f32.vlgmr.msra.gmra.mxu1 %vm356_vm2, %v1485_v53  ;;  %4233 = vmatprep.subr.mxu1 %v4347_v1  ;;  %v1835_v53 = vsub.s32 2, %v4640_v41 }
  0xc5   : > { %v1657_v63 = vpop.permute.xlu0 %1656  ;;  %4235 = vmatprep.mubr.msk.f32.mxu1 %vm4348_vm0, %v4347_v1 }
  0xc6   : > { %v1659_v62 = vpop.permute.xlu1 %1658  ;;  %v1662_v0 = vsel %vm1660_vm10, %v1655_v56, %v1657_v63 }
  0xc7   : > { %v1663_v2 = vsel %vm1660_vm10, %v1657_v63, %v1659_v62  ;;  %4103 = vmatprep.subr.msk.mxu0 %vm359_vm1, %v1662_v0 }
  0xc8   : > { %4234 = vmatpush3.msk.msra.mxu1 %vm359_vm1, %v1663_v2  ;;  %4104 = vmatpush1.msk.msra.mxu0 %vm359_vm1, %v1661_v3  ;;  %v1836_v2 = vrot.slane %v340_v52, %v1835_v53 }
  0xc9   : > { %4238 = vmatprep.subr.mxu1 %v4347_v1  ;;  %v1651_v4 = vpop.permute.xlu0 %1650 }
  0xca   : > { %4105 = vmatmul.mubr.msk.f32.vlgmr.msra.gmra.mxu0 %vm356_vm2, %v1651_v4  ;;  %4236 = vmatmul.mubr.msk.f32.vlgmr.msra.gmra.mxu1 %vm356_vm2, %v1651_v4 }
  0xcb   : > { %4240 = vmatprep.mubr.msk.f32.mxu1 %vm4348_vm0, %v4347_v1  ;;  %1929 = vmatprep.mubr.f32.mxu0 %v4347_v1 }
  0xd6   : > { %v1819_v58 = vpop.permute.xlu0 %1818 }
 0x143   : > { %v503_v6 = vpop.f32.mrf.mxu1 }
 0x145   : > { %v4197_v7 = vpop.f32.mrf.mxu1 }
 0x147   : > { %v652_v8 = vpop.f32.mrf.mxu1 }
 0x148   : > { %v653_v32 = vadd.f32 %v652_v8, %v503_v6 }
 0x149   : > { %v4202_v9 = vpop.f32.mrf.mxu1  ;;  %v432_v12 = vpop.f32.mrf.mxu0 }
 0x14b   : > { %v812_v10 = vpop.f32.mrf.mxu1  ;;  %v434_v13 = vpop.f32.mrf.mxu0 }
 0x14c   : > { %v818_v36 = vadd.f32 %v812_v10, %v653_v32 }
 0x14d   : > { %v4207_v11 = vpop.f32.mrf.mxu1  ;;  %v581_v15 = vpop.f32.mrf.mxu0 }
 0x14e   : > { %v582_v33 = vadd.f32 %v581_v15, %v432_v12 }
 0x14f   : > { %v583_v17 = vpop.f32.mrf.mxu0 }
 0x150   : > { %v584_v55 = vadd.f32 %v583_v17, %v434_v13 }
 0x151   : > { %v741_v20 = vpop.f32.mrf.mxu0 }
 0x152   : > { %v816_v37 = vadd.f32 %v741_v20, %v582_v33  ;;  %v1843_v20 = vld [vmem:[%s4870_s5] sm:$0xff] }
 0x153   : > { %v743_v21 = vpop.f32.mrf.mxu0 }
 0x154   : > { %v817_v62 = vadd.f32 %v743_v21, %v584_v55  ;;  %v1847_v21 = vpop.permute.xlu1 %1846 }
 0x158   : > { %v908_v22 = vpop.f32.mrf.mxu0 }
 0x159   : > { %v983_v38 = vadd.f32 %v908_v22, %v816_v37  ;;  %v2150_v22 = vpop.permute.xlu1 %2149 }
 0x15a   : > { %v910_v23 = vpop.f32.mrf.mxu0 }
 0x15b   : > { %v984_v4 = vadd.f32 %v910_v23, %v817_v62 }
 0x15c   : > { %v979_v14 = vpop.f32.mrf.mxu1 }
 0x15d   : > { %v985_v39 = vadd.f32 %v979_v14, %v818_v36  ;;  %v4707_v23 = vpop.permute.xlu1 %2308 }
 0x15e   : > { %v4212_v16 = vpop.f32.mrf.mxu1 }
 0x15f   : > { %v1831_v16 = vsub.s32 1, %v4640_v41  ;;  %v3975_v41 = vld [vmem:[%s4873_s8] sm:$0xff] }
 0x161   : > { %v1832_v17 = vrot.slane %v340_v52, %v1831_v16 }
 0x162   : > { %v1145_v18 = vpop.f32.mrf.mxu1  ;;  %v1074_v25 = vpop.f32.mrf.mxu0 }
 0x163   : > { %v1149_v42 = vadd.f32 %v1074_v25, %v983_v38  ;;  %v1151_v43 = vadd.f32 %v1145_v18, %v985_v39 }
 0x164   : > { %v4217_v19 = vpop.f32.mrf.mxu1  ;;  %v1076_v27 = vpop.f32.mrf.mxu0 }
 0x165   : > { %v1150_v8 = vadd.f32 %v1076_v27, %v984_v4 }
 0x16c   : > { %v1240_v29 = vpop.f32.mrf.mxu0 }
 0x16d   : > { %v1315_v46 = vadd.f32 %v1240_v29, %v1149_v42 }
 0x16e   : > { %v1242_v31 = vpop.f32.mrf.mxu0 }
 0x16f   : > { %v1316_v11 = vadd.f32 %v1242_v31, %v1150_v8 }
 0x170   : > { %v1311_v24 = vpop.f32.mrf.mxu1 }
 0x171   : > { %v1317_v47 = vadd.f32 %v1311_v24, %v1151_v43 }
 0x172   : > { %v4222_v26 = vpop.f32.mrf.mxu1 }
 0x176   : > { %v1477_v28 = vpop.f32.mrf.mxu1  ;;  %v1406_v34 = vpop.f32.mrf.mxu0 }
 0x177   : > { %v1481_v50 = vadd.f32 %v1406_v34, %v1315_v46  ;;  %v1483_v51 = vadd.f32 %v1477_v28, %v1317_v47 }
 0x178   : > { %v4227_v30 = vpop.f32.mrf.mxu1  ;;  %v1408_v40 = vpop.f32.mrf.mxu0 }
 0x179   : > { %v1482_v12 = vadd.f32 %v1408_v40, %v1316_v11 }
 0x180   : > { %v1572_v44 = vpop.f32.mrf.mxu0 }
 0x181   : > { %v1647_v56 = vadd.f32 %v1572_v44, %v1481_v50 }
 0x182   : > { %v1574_v54 = vpop.f32.mrf.mxu0 }
 0x183   : > { %v1648_v14 = vadd.f32 %v1574_v54, %v1482_v12 }
 0x184   : > { %v1643_v45 = vpop.f32.mrf.mxu1 }
 0x185   : > { %v1649_v57 = vadd.f32 %v1643_v45, %v1483_v51 }
 0x186   : > { %v4232_v48 = vpop.f32.mrf.mxu1 }
 0x18a   : > { %v1738_v59 = vpop.f32.mrf.mxu0  ;;  %v1809_v60 = vpop.f32.mrf.mxu1 }
 0x18b   : > { %v1813_v63 = vadd.f32 %v1738_v59, %v1647_v56  ;;  %v1815_v0 = vadd.f32 %v1809_v60, %v1649_v57 }
 0x18c   : > { %v4237_v3 = vpop.f32.mrf.mxu1  ;;  %v1740_v13 = vpop.f32.mrf.mxu0 }
 0x18d   : > { %v1821_v6 = vadd.f32 %v1819_v58, %v1813_v63  ;;  %v1823_v7 = vadd.f32 %v1819_v58, %v1815_v0  ;;  %v1814_v15 = vadd.f32 %v1740_v13, %v1648_v14 }
 0x18f   : > { %v4651_v9 = vmul.f32 %v1828_v61, %v1821_v6  ;;  %v1842_v10 = vmul.f32 %v1836_v2, %v1823_v7  ;;  %v1822_v18 = vadd.f32 %v1819_v58, %v1814_v15 }
 0x191   : > { %1855 = vrot.lane.b32.xlu1 %v1842_v10, %s4349_s18  ;;  %1851 = vrot.lane.b32.xlu0 %v4651_v9, %s4349_s18  ;;  %v4668_v19 = vmul.f32 %v1832_v17, %v1822_v18 }
 0x195   : > { %2155 = vrot.lane.b32.xlu1 %v1842_v10, %s4350_s19  ;;  %2151 = vrot.lane.b32.xlu0 %v4651_v9, %s4350_s19 }
 0x199   : > { %2314 = vrot.lane.b32.xlu1 %v1842_v10, %s4352_s21  ;;  %2310 = vrot.lane.b32.xlu0 %v4651_v9, %s4352_s21 }
 0x19d   : > { %2473 = vrot.lane.b32.xlu1 %v1842_v10, %s4354_s23  ;;  %2469 = vrot.lane.b32.xlu0 %v4651_v9, %s4354_s23 }
 0x1a1   : > { %1853 = vrot.lane.b32.xlu1 %v4668_v19, %s4349_s18  ;;  %2628 = vrot.lane.b32.xlu0 %v4651_v9, %s4355_s24 }
 0x1a5   : > { %2467 = vrot.lane.b32.xlu1 %v4632_v5, %s4363_s12  ;;  %2787 = vrot.lane.b32.xlu0 %v4651_v9, %s4357_s26  ;;  %s4365_s12 = smov 80  }
 0x1a9   : > { %2632 = vrot.lane.b32.xlu1 %v1842_v10, %s4355_s24  ;;  %2946 = vrot.lane.b32.xlu0 %v4651_v9, %s4358_s27 }
 0x1ad   : > { %2626 = vrot.lane.b32.xlu1 %v4632_v5, %s4364_s29  ;;  %2153 = vrot.lane.b32.xlu0 %v4668_v19, %s4350_s19  ;;  %s4367_s19 = smov 64  }
 0x1b1   : > { %2791 = vrot.lane.b32.xlu1 %v1842_v10, %s4357_s26  ;;  %2312 = vrot.lane.b32.xlu0 %v4668_v19, %s4352_s21 }
 0x1b5   : > { %2785 = vrot.lane.b32.xlu1 %v4632_v5, %s4365_s12  ;;  %2471 = vrot.lane.b32.xlu0 %v4668_v19, %s4354_s23 }
 0x1b9   : > { %2950 = vrot.lane.b32.xlu1 %v1842_v10, %s4358_s27  ;;  %2630 = vrot.lane.b32.xlu0 %v4668_v19, %s4355_s24 }
 0x1bd   : > { %2944 = vrot.lane.b32.xlu1 %v4632_v5, %s4366_s13  ;;  %2789 = vrot.lane.b32.xlu0 %v4668_v19, %s4357_s26 }
 0x1c1   : > { %3109 = vrot.lane.b32.xlu1 %v1842_v10, %s4361_s11  ;;  %2948 = vrot.lane.b32.xlu0 %v4668_v19, %s4358_s27 }
 0x1c5   : > { %3103 = vrot.lane.b32.xlu1 %v4632_v5, %s4367_s19  ;;  %3107 = vrot.lane.b32.xlu0 %v4668_v19, %s4361_s11 }
 0x1c9   : > { %3105 = vrot.lane.b32.xlu0 %v4651_v9, %s4361_s11 }
 0x1cd   : > { %3264 = vperm.xlu0 %4334, %v1843_v20  }
 0x203   : > { %v1856_v24 = vpop.permute.xlu1 %1855  ;;  %v1852_v25 = vpop.permute.xlu0 %1851 }
 0x204   : > { %4239 = vmatpush3.msra.mxu1 %v1856_v24 }
 0x205   : > { %4241 = vmatmul.mubr.msk.f32.vlgmr.msra.gmra.mxu1 %vm1862_vm11, %v1847_v21  ;;  %4243 = vmatprep.subr.mxu1 %v4347_v1 }
 0x206   : > { %4244 = vmatpush3.msra.mxu1 %v1842_v10  ;;  %4245 = vmatprep.mubr.msk.f32.mxu1 %vm4348_vm0, %v4347_v1 }
 0x207   : > { %v2156_v26 = vpop.permute.xlu1 %2155  ;;  %v2152_v27 = vpop.permute.xlu0 %2151  ;;  %4248 = vmatprep.subr.mxu1 %v4347_v1 }
 0x209   : > { %4246 = vmatmul.mubr.msk.f32.vlgmr.msra.gmra.mxu1 %vm1862_vm11, %v4632_v5 }
 0x20a   : > { %4249 = vmatpush3.msra.mxu1 %v2156_v26  ;;  %4250 = vmatprep.mubr.msk.f32.mxu1 %vm4348_vm0, %v4347_v1 }
 0x20b   : > { %v2315_v28 = vpop.permute.xlu1 %2314  ;;  %v2311_v29 = vpop.permute.xlu0 %2310  ;;  %4253 = vmatprep.subr.mxu1 %v4347_v1 }
 0x20d   : > { %4251 = vmatmul.mubr.msk.f32.vlgmr.msra.gmra.mxu1 %vm1862_vm11, %v2150_v22 }
 0x20e   : > { %4254 = vmatpush3.msra.mxu1 %v2315_v28  ;;  %4255 = vmatprep.mubr.msk.f32.mxu1 %vm4348_vm0, %v4347_v1 }
 0x20f   : > { %v2474_v30 = vpop.permute.xlu1 %2473  ;;  %v2470_v31 = vpop.permute.xlu0 %2469  ;;  %4258 = vmatprep.subr.mxu1 %v4347_v1 }
 0x211   : > { %4256 = vmatmul.mubr.msk.f32.vlgmr.msra.gmra.mxu1 %vm1862_vm11, %v4707_v23 }
 0x212   : > { %4259 = vmatpush3.msra.mxu1 %v2474_v30  ;;  %4260 = vmatprep.mubr.msk.f32.mxu1 %vm4348_vm0, %v4347_v1 }
 0x213   : > { %v1854_v32 = vpop.permute.xlu1 %1853  ;;  %v2629_v33 = vpop.permute.xlu0 %2628  ;;  %4263 = vmatprep.subr.mxu1 %v4347_v1 }
 0x214   : > { %v1857_v34 = vsel %vm353_vm3, %v1852_v25, %v1854_v32  ;;  %v1858_v35 = vsel %vm353_vm3, %v1854_v32, %v1856_v24 }
 0x215   : > { %1895 = vmatprep.subr.mxu0 %v1858_v35 }
 0x216   : > { %1896 = vmatpush1.msra.mxu0 %v1857_v34 }
 0x217   : > { %v2468_v36 = vpop.permute.xlu1 %2467  ;;  %4108 = vmatmul.mubr.msk.f32.vlgmr.msra.gmra.mxu0 %vm1862_vm11, %v1847_v21  ;;  %2038 = vmatprep.subr.mxu0 %v4668_v19  ;;  %v2788_v37 = vpop.permute.xlu0 %2787 }
 0x218   : > { %2039 = vmatpush1.msra.mxu0 %v4651_v9  ;;  %4261 = vmatmul.mubr.msk.f32.vlgmr.msra.gmra.mxu1 %vm1862_vm11, %v2468_v36  ;;  %v4785_v9 = vld [vmem:[%s4872_s7] sm:$0xff] }
 0x219   : > { %2072 = vmatprep.mubr.f32.mxu0 %v4347_v1  ;;  %4265 = vmatprep.mubr.msk.f32.mxu1 %vm4348_vm0, %v4347_v1 }
 0x21a   : > { %3291 = vrot.lane.b32.xlu0 %v4785_v9, %s4351_s20 }
 0x21b   : > { %v2633_v38 = vpop.permute.xlu1 %2632  ;;  %4110 = vmatmul.mubr.msk.f32.vlgmr.msra.gmra.mxu0 %vm1862_vm11, %v4632_v5  ;;  %v2947_v39 = vpop.permute.xlu0 %2946 }
 0x21c   : > { %4264 = vmatpush3.msra.mxu1 %v2633_v38  ;;  %2228 = vmatprep.mubr.f32.mxu0 %v4347_v1 }
 0x21d   : > { %4268 = vmatprep.subr.mxu1 %v4347_v1 }
 0x21f   : > { %v2627_v40 = vpop.permute.xlu1 %2626  ;;  %v2154_v42 = vpop.permute.xlu0 %2153 }
 0x220   : > { %v2157_v43 = vsel %vm664_vm4, %v2152_v27, %v2154_v42  ;;  %4266 = vmatmul.mubr.msk.f32.vlgmr.msra.gmra.mxu1 %vm1862_vm11, %v2627_v40  ;;  %v2158_v44 = vsel %vm664_vm4, %v2154_v42, %v2156_v26 }
 0x221   : > { %2194 = vmatprep.subr.mxu0 %v2158_v44  ;;  %4270 = vmatprep.mubr.msk.f32.mxu1 %vm4348_vm0, %v4347_v1 }
 0x222   : > { %2195 = vmatpush1.msra.mxu0 %v2157_v43 }
 0x223   : > { %v2792_v5 = vpop.permute.xlu1 %2791  ;;  %4112 = vmatmul.mubr.msk.f32.vlgmr.msra.gmra.mxu0 %vm1862_vm11, %v2150_v22  ;;  %v2313_v45 = vpop.permute.xlu0 %2312 }
 0x224   : > { %v2316_v46 = vsel %vm830_vm5, %v2311_v29, %v2313_v45  ;;  %4269 = vmatpush3.msra.mxu1 %v2792_v5  ;;  %v2317_v47 = vsel %vm830_vm5, %v2313_v45, %v2315_v28  ;;  %2387 = vmatprep.mubr.f32.mxu0 %v4347_v1 }
 0x225   : > { %2353 = vmatprep.subr.mxu0 %v2317_v47  ;;  %4273 = vmatprep.subr.mxu1 %v4347_v1 }
 0x226   : > { %2354 = vmatpush1.msra.mxu0 %v2316_v46 }
 0x227   : > { %v2786_v48 = vpop.permute.xlu1 %2785  ;;  %4114 = vmatmul.mubr.msk.f32.vlgmr.msra.gmra.mxu0 %vm1862_vm11, %v4707_v23  ;;  %v2472_v50 = vpop.permute.xlu0 %2471 }
 0x228   : > { %v2475_v51 = vsel %vm996_vm6, %v2470_v31, %v2472_v50  ;;  %4271 = vmatmul.mubr.msk.f32.vlgmr.msra.gmra.mxu1 %vm1862_vm11, %v2786_v48  ;;  %v2476_v52 = vsel %vm996_vm6, %v2472_v50, %v2474_v30  ;;  %2546 = vmatprep.mubr.f32.mxu0 %v4347_v1 }
 0x229   : > { %2512 = vmatprep.subr.mxu0 %v2476_v52  ;;  %4275 = vmatprep.mubr.msk.f32.mxu1 %vm4348_vm0, %v4347_v1 }
 0x22a   : > { %2513 = vmatpush1.msra.mxu0 %v2475_v51 }
 0x22b   : > { %v2951_v54 = vpop.permute.xlu1 %2950  ;;  %4116 = vmatmul.mubr.msk.f32.vlgmr.msra.gmra.mxu0 %vm1862_vm11, %v2468_v36  ;;  %v2631_v55 = vpop.permute.xlu0 %2630 }
 0x22c   : > { %v2634_v56 = vsel %vm1162_vm7, %v2629_v33, %v2631_v55  ;;  %4274 = vmatpush3.msra.mxu1 %v2951_v54  ;;  %v2635_v57 = vsel %vm1162_vm7, %v2631_v55, %v2633_v38  ;;  %2705 = vmatprep.mubr.f32.mxu0 %v4347_v1 }
 0x22d   : > { %2671 = vmatprep.subr.mxu0 %v2635_v57  ;;  %4278 = vmatprep.subr.mxu1 %v4347_v1 }
 0x22e   : > { %2672 = vmatpush1.msra.mxu0 %v2634_v56  ;;  %v1844_v56 = vld [vmem:[%s4871_s6] sm:$0x7] }
 0x22f   : > { %v2945_v58 = vpop.permute.xlu1 %2944  ;;  %4118 = vmatmul.mubr.msk.f32.vlgmr.msra.gmra.mxu0 %vm1862_vm11, %v2627_v40  ;;  %v2790_v59 = vpop.permute.xlu0 %2789 }
 0x230   : > { %v2793_v60 = vsel %vm1328_vm8, %v2788_v37, %v2790_v59  ;;  %4276 = vmatmul.mubr.msk.f32.vlgmr.msra.gmra.mxu1 %vm1862_vm11, %v2945_v58  ;;  %v2794_v61 = vsel %vm1328_vm8, %v2790_v59, %v2792_v5  ;;  %2864 = vmatprep.mubr.f32.mxu0 %v4347_v1 }
 0x231   : > { %2830 = vmatprep.subr.mxu0 %v2794_v61  ;;  %4280 = vmatprep.mubr.msk.f32.mxu1 %vm4348_vm0, %v4347_v1 }
 0x232   : > { %2831 = vmatpush1.msra.mxu0 %v2793_v60 }
 0x233   : > { %v3110_v62 = vpop.permute.xlu1 %3109  ;;  %4120 = vmatmul.mubr.msk.f32.vlgmr.msra.gmra.mxu0 %vm1862_vm11, %v2786_v48  ;;  %v2949_v63 = vpop.permute.xlu0 %2948 }
 0x234   : > { %v2952_v0 = vsel %vm1494_vm9, %v2947_v39, %v2949_v63  ;;  %4279 = vmatpush3.msra.mxu1 %v3110_v62  ;;  %v2953_v2 = vsel %vm1494_vm9, %v2949_v63, %v2951_v54  ;;  %3023 = vmatprep.mubr.f32.mxu0 %v4347_v1 }
 0x235   : > { %2989 = vmatprep.subr.mxu0 %v2953_v2  ;;  %v3282_v2 = vrot.slane %v1844_v56, %v1835_v53 }
 0x236   : > { %2990 = vmatpush1.msra.mxu0 %v2952_v0 }
 0x237   : > { %v3104_v3 = vpop.permute.xlu1 %3103  ;;  %4122 = vmatmul.mubr.msk.f32.vlgmr.msra.gmra.mxu0 %vm1862_vm11, %v2945_v58  ;;  %v3108_v4 = vpop.permute.xlu0 %3107 }
 0x238   : > { %4281 = vmatmul.mubr.msk.f32.vlgmr.msra.gmra.mxu1 %vm1862_vm11, %v3104_v3  ;;  %v3112_v6 = vsel %vm1660_vm10, %v3108_v4, %v3110_v62  ;;  %3182 = vmatprep.mubr.f32.mxu0 %v4347_v1 }
 0x239   : > { %3148 = vmatprep.subr.mxu0 %v3112_v6 }
 0x23b   : > { %v3106_v7 = vpop.permute.xlu0 %3105 }
 0x23c   : > { %v3111_v8 = vsel %vm1660_vm10, %v3106_v7, %v3108_v4 }
 0x23d   : > { %3149 = vmatpush1.msra.mxu0 %v3111_v8 }
 0x23e   : > { %4124 = vmatmul.mubr.msk.f32.vlgmr.msra.gmra.mxu0 %vm1862_vm11, %v3104_v3 }
 0x23f   : > { %3377 = vmatprep.mubr.f32.mxu0 %v4347_v1 }
 0x248   : > { %v3265_v32 = vpop.permute.xlu0 %3264 }
 0x28c   : > { %v4789_v38 = vpop.permute.xlu0 %3291 }
 0x28d   : > { %4285 = vmatprep.mubr.msk.f32.mxu1 %vm1862_vm11, %v4789_v38 }
 0x2c5   : > { %v2002_v10 = vpop.f32.mrf.mxu1 }
 0x2c7   : > { %v4242_v11 = vpop.f32.mrf.mxu1 }
 0x2c9   : > { %v2145_v12 = vpop.f32.mrf.mxu1 }
 0x2ca   : > { %v2146_v34 = vadd.f32 %v2145_v12, %v2002_v10 }
 0x2cb   : > { %v4247_v13 = vpop.f32.mrf.mxu1 }
 0x2cd   : > { %v2301_v14 = vpop.f32.mrf.mxu1 }
 0x2ce   : > { %v2307_v36 = vadd.f32 %v2301_v14, %v2146_v34 }
 0x2cf   : > { %v4252_v15 = vpop.f32.mrf.mxu1 }
 0x2d1   : > { %v2460_v17 = vpop.f32.mrf.mxu1 }
 0x2d2   : > { %v2466_v39 = vadd.f32 %v2460_v17, %v2307_v36  ;;  %v3274_v17 = vrot.slane %v1844_v56, %v1827_v49  ;;  %v3976_v49 = vld [vmem:[%s4873_s8 + $0x8] sm:$0xff] }
 0x2d3   : > { %v4257_v18 = vpop.f32.mrf.mxu1 }
 0x2d7   : > { %v1931_v19 = vpop.f32.mrf.mxu0 }
 0x2d8   : > { %v2619_v20 = vpop.f32.mrf.mxu1 }
 0x2d9   : > { %v1933_v21 = vpop.f32.mrf.mxu0  ;;  %v2625_v43 = vadd.f32 %v2619_v20, %v2466_v39 }
 0x2da   : > { %v4262_v22 = vpop.f32.mrf.mxu1 }
 0x2db   : > { %v2074_v23 = vpop.f32.mrf.mxu0  ;;  %v3278_v22 = vrot.slane %v1844_v56, %v1831_v16 }
 0x2dc   : > { %v2075_v44 = vadd.f32 %v2074_v23, %v1931_v19  ;;  %v338_v23 = vld [vmem:[%s4872_s7 + $0x8] sm:$0xff] }
 0x2dd   : > { %v2076_v25 = vpop.f32.mrf.mxu0 }
 0x2de   : > { %v2077_v46 = vadd.f32 %v2076_v25, %v1933_v21 }
 0x2e0   : > { %v2778_v24 = vpop.f32.mrf.mxu1 }
 0x2e1   : > { %v2784_v47 = vadd.f32 %v2778_v24, %v2625_v43 }
 0x2e2   : > { %v4267_v26 = vpop.f32.mrf.mxu1 }
 0x2e3   : > { %v2230_v27 = vpop.f32.mrf.mxu0 }
 0x2e4   : > { %v2305_v48 = vadd.f32 %v2230_v27, %v2075_v44 }
 0x2e5   : > { %v2232_v28 = vpop.f32.mrf.mxu0 }
 0x2e6   : > { %v2306_v51 = vadd.f32 %v2232_v28, %v2077_v46 }
 0x2e7   : > { %v2389_v29 = vpop.f32.mrf.mxu0 }
 0x2e8   : > { %v2937_v30 = vpop.f32.mrf.mxu1  ;;  %v2464_v52 = vadd.f32 %v2389_v29, %v2305_v48 }
 0x2e9   : > { %v2391_v31 = vpop.f32.mrf.mxu0  ;;  %v2943_v54 = vadd.f32 %v2937_v30, %v2784_v47 }
 0x2ea   : > { %v4272_v33 = vpop.f32.mrf.mxu1  ;;  %v2465_v57 = vadd.f32 %v2391_v31, %v2306_v51 }
 0x2eb   : > { %v2548_v35 = vpop.f32.mrf.mxu0 }
 0x2ec   : > { %v2623_v58 = vadd.f32 %v2548_v35, %v2464_v52 }
 0x2ed   : > { %v2550_v37 = vpop.f32.mrf.mxu0 }
 0x2ee   : > { %v2624_v62 = vadd.f32 %v2550_v37, %v2465_v57 }
 0x2ef   : > { %v2707_v40 = vpop.f32.mrf.mxu0 }
 0x2f0   : > { %v3096_v42 = vpop.f32.mrf.mxu1  ;;  %v2782_v63 = vadd.f32 %v2707_v40, %v2623_v58 }
 0x2f1   : > { %v2709_v5 = vpop.f32.mrf.mxu0  ;;  %v3102_v59 = vadd.f32 %v3096_v42, %v2943_v54 }
 0x2f2   : > { %v4277_v45 = vpop.f32.mrf.mxu1  ;;  %v2783_v4 = vadd.f32 %v2709_v5, %v2624_v62 }
 0x2f3   : > { %v2866_v50 = vpop.f32.mrf.mxu0 }
 0x2f4   : > { %v2941_v6 = vadd.f32 %v2866_v50, %v2782_v63 }
 0x2f5   : > { %v2868_v55 = vpop.f32.mrf.mxu0 }
 0x2f6   : > { %v2942_v10 = vadd.f32 %v2868_v55, %v2783_v4 }
 0x2f7   : > { %v3025_v60 = vpop.f32.mrf.mxu0 }
 0x2f8   : > { %v3255_v61 = vpop.f32.mrf.mxu1  ;;  %v3100_v11 = vadd.f32 %v3025_v60, %v2941_v6 }
 0x2f9   : > { %v3261_v0 = vadd.f32 %v3255_v61, %v3102_v59  ;;  %v3027_v8 = vpop.f32.mrf.mxu0 }
 0x2fa   : > { %v4282_v3 = vpop.f32.mrf.mxu1  ;;  %v3101_v14 = vadd.f32 %v3027_v8, %v2942_v10 }
 0x2fb   : > { %v3269_v7 = vadd.f32 %v3265_v32, %v3261_v0 }
 0x2fd   : > { %v3288_v12 = vmul.f32 %v3282_v2, %v3269_v7 }
 0x2fe   : > { %v3184_v13 = vpop.f32.mrf.mxu0 }
 0x2ff   : > { %v3259_v15 = vadd.f32 %v3184_v13, %v3100_v11  ;;  %3302 = vrot.lane.b32.xlu0 %v3288_v12, %s4349_s18 }
 0x300   : > { %v3186_v18 = vpop.f32.mrf.mxu0 }
 0x301   : > { %v3267_v19 = vadd.f32 %v3265_v32, %v3259_v15  ;;  %v3260_v20 = vadd.f32 %v3186_v18, %v3101_v14 }
 0x303   : > { %v3286_v53 = vmul.f32 %v3274_v17, %v3267_v19  ;;  %v3268_v21 = vadd.f32 %v3265_v32, %v3260_v20 }
 0x305   : > { %3625 = vrot.lane.b32.xlu0 %v3286_v53, %s4352_s21  ;;  %3298 = vrot.lane.b32.xlu1 %v3286_v53, %s4349_s18  ;;  %v3287_v24 = vmul.f32 %v3278_v22, %v3268_v21 }
 0x309   : > { %3623 = vrot.lane.b32.xlu0 %v338_v23, %s4356_s25  ;;  %3300 = vrot.lane.b32.xlu1 %v3287_v24, %s4349_s18 }
 0x30d   : > { %3627 = vrot.lane.b32.xlu0 %v3287_v24, %s4352_s21  ;;  %3293 = vrot.lane.b32.xlu1 %v338_v23, %s4351_s20 }
 0x311   : > { %3806 = vrot.lane.b32.xlu0 %v3288_v12, %s4354_s23  ;;  %3629 = vrot.lane.b32.xlu1 %v3288_v12, %s4352_s21  ;;  %s4303_s21 = smul.u32 48, %s4876_s10 }
 0x315   : > { %3798 = vrot.lane.b32.xlu0 %v4785_v9, %s4359_s28  ;;  %3621 = vrot.lane.b32.xlu1 %v4785_v9, %s4356_s25 }
 0x319   : > { %3979 = vperm.xlu0 %4334, %v3975_v41   ;;  %3804 = vrot.lane.b32.xlu1 %v3287_v24, %s4354_s23 }
 0x31d   : > { %3802 = vrot.lane.b32.xlu1 %v3286_v53, %s4354_s23 }
 0x321   : > { %3800 = vrot.lane.b32.xlu1 %v338_v23, %s4359_s28  ;;  %s332_s28 = scalar_lea.vmem %s4874_s9, %s4303_s21 }
 0x325   : > { %3984 = vperm.xlu1 %4335, %v3976_v49  }
 0x371   : > { %v3303_v16 = vpop.permute.xlu0 %3302 }
 0x372   : > { %4283 = vmatprep.subr.mxu1 %v3303_v16 }
 0x373   : > { %4284 = vmatpush3.msra.mxu1 %v3303_v16 }
 0x374   : > { %3499 = vmatprep.subr.mxu1 %v3287_v24 }
 0x377   : > { %v3299_v25 = vpop.permute.xlu1 %3298  ;;  %v3626_v26 = vpop.permute.xlu0 %3625 }
 0x37b   : > { %v3301_v27 = vpop.permute.xlu1 %3300  ;;  %v3624_v29 = vpop.permute.xlu0 %3623 }
 0x37c   : > { %v3304_v28 = vsel %vm353_vm3, %v3299_v25, %v3301_v27  ;;  %v3305_v30 = vsel %vm353_vm3, %v3301_v27, %v3303_v16 }
 0x37d   : > { %3343 = vmatprep.subr.mxu0 %v3305_v30 }
 0x37e   : > { %3344 = vmatpush1.msra.mxu0 %v3304_v28 }
 0x37f   : > { %v3294_v31 = vpop.permute.xlu1 %3293  ;;  %4126 = vmatmul.mubr.msk.f32.vlgmr.msra.gmra.mxu0 %vm1862_vm11, %v4789_v38  ;;  %4288 = vmatprep.subr.mxu0 %v3288_v12  ;;  %v3628_v32 = vpop.permute.xlu0 %3627 }
 0x380   : > { %4286 = vmatmul.mubr.msk.f32.vlgmr.msra.gmra.mxu1 %vm1862_vm11, %v3294_v31  ;;  %4289 = vmatpush3.msra.mxu0 %v3288_v12  ;;  %v3631_v35 = vsel %vm830_vm5, %v3626_v26, %v3628_v32 }
 0x381   : > { %3500 = vmatpush1.msra.mxu1 %v3286_v53  ;;  %3383 = vmatprep.mubr.f32.mxu0 %v4347_v1 }
 0x382   : > { %3533 = vmatprep.mubr.f32.mxu1 %v4347_v1 }
 0x383   : > { %v3630_v33 = vpop.permute.xlu1 %3629  ;;  %4127 = vmatmul.mubr.msk.f32.gmra.mxu0 %vm1862_vm11, %v3294_v31  ;;  %v3807_v37 = vpop.permute.xlu0 %3806 }
 0x384   : > { %4130 = vmatmul.mubr.msk.f32.vlgmr.msra.gmra.mxu1 %vm1862_vm11, %v4785_v9  ;;  %4293 = vmatprep.subr.mxu1 %v3630_v33  ;;  %v3632_v34 = vsel %vm830_vm5, %v3628_v32, %v3630_v33 }
 0x385   : > { %3670 = vmatprep.subr.mxu0 %v3632_v34  ;;  %4294 = vmatpush3.msra.mxu1 %v3630_v33 }
 0x386   : > { %4290 = vmatprep.mubr.msk.f32.mxu0 %vm1862_vm11, %v4785_v9  ;;  %3539 = vmatprep.mubr.f32.mxu1 %v4347_v1 }
 0x387   : > { %v3622_v36 = vpop.permute.xlu1 %3621  ;;  %4291 = vmatmul.mubr.msk.f32.vlgmr.msra.gmra.mxu0 %vm1862_vm11, %v338_v23  ;;  %v3799_v39 = vpop.permute.xlu0 %3798 }
 0x388   : > { %3671 = vmatpush1.msra.mxu0 %v3631_v35  ;;  %4131 = vmatmul.mubr.msk.f32.gmra.mxu1 %vm1862_vm11, %v338_v23 }
 0x389   : > { %4298 = vmatprep.subr.mxu0 %v3807_v37  ;;  %4295 = vmatprep.mubr.msk.f32.mxu1 %vm1862_vm11, %v3622_v36 }
 0x38a   : > { %3704 = vmatprep.mubr.f32.mxu0 %v4347_v1 }
 0x38b   : > { %v3805_v38 = vpop.permute.xlu1 %3804  ;;  %4134 = vmatmul.mubr.msk.f32.vlgmr.msra.gmra.mxu0 %vm1862_vm11, %v3622_v36 }
 0x38c   : > { %4299 = vmatpush3.msra.mxu0 %v3807_v37  ;;  %4296 = vmatmul.mubr.msk.f32.vlgmr.msra.gmra.mxu1 %vm1862_vm11, %v3624_v29  ;;  %v3809_v9 = vsel %vm996_vm6, %v3805_v38, %v3807_v37 }
 0x38d   : > { %3847 = vmatprep.subr.mxu1 %v3809_v9  ;;  %3710 = vmatprep.mubr.f32.mxu0 %v4347_v1 }
 0x38e   : > { %3881 = vmatprep.mubr.f32.mxu1 %v4347_v1 }
 0x38f   : > { %v3803_v40 = vpop.permute.xlu1 %3802  ;;  %4135 = vmatmul.mubr.msk.f32.gmra.mxu0 %vm1862_vm11, %v3624_v29 }
 0x390   : > { %v3808_v42 = vsel %vm996_vm6, %v3803_v40, %v3805_v38  ;;  %4300 = vmatprep.mubr.msk.f32.mxu0 %vm1862_vm11, %v3799_v39 }
 0x391   : > { %3848 = vmatpush1.msra.mxu1 %v3808_v42 }
 0x392   : > { %4138 = vmatmul.mubr.msk.f32.vlgmr.msra.gmra.mxu1 %vm1862_vm11, %v3799_v39 }
 0x393   : > { %v3801_v43 = vpop.permute.xlu1 %3800  ;;  %3887 = vmatprep.mubr.f32.mxu1 %v4347_v1 }
 0x394   : > { %4301 = vmatmul.mubr.msk.f32.vlgmr.msra.gmra.mxu0 %vm1862_vm11, %v3801_v43  ;;  %v3980_v6 = vpop.permute.xlu0 %3979 }
 0x396   : > { %4139 = vmatmul.mubr.msk.f32.gmra.mxu1 %vm1862_vm11, %v3801_v43 }
 0x3a0   : > { %v3985_v12 = vpop.permute.xlu1 %3984 }
 0x43f   : > { %v3379_v44 = vpop.f32.mrf.mxu0 }
 0x440   : > { %v4287_v5 = vpop.f32.mrf.mxu1 }
 0x441   : > { %v3381_v45 = vpop.f32.mrf.mxu0 }
 0x442   : > { %v3456_v46 = vpop.f32.mrf.mxu1 }
 0x443   : > { %v3385_v47 = vpop.f32.mrf.mxu0 }
 0x444   : > { %v3535_v48 = vpop.f32.mrf.mxu1 }
 0x445   : > { %v3387_v50 = vpop.f32.mrf.mxu0  ;;  %v3536_v59 = vadd.f32 %v3535_v48, %v3379_v44 }
 0x446   : > { %v3537_v51 = vpop.f32.mrf.mxu1 }
 0x447   : > { %v4292_v52 = vpop.f32.mrf.mxu0  ;;  %v3538_v62 = vadd.f32 %v3537_v51, %v3381_v45 }
 0x448   : > { %v3541_v54 = vpop.f32.mrf.mxu1  ;;  %v3618_v63 = vadd.f32 %v4292_v52, %v4287_v5 }
 0x449   : > { %v3612_v55 = vpop.f32.mrf.mxu0  ;;  %v3542_v7 = vadd.f32 %v3541_v54, %v3385_v47 }
 0x44a   : > { %v3543_v56 = vpop.f32.mrf.mxu1  ;;  %v3613_v3 = vadd.f32 %v3612_v55, %v3456_v46 }
 0x44b   : > { %v3706_v57 = vpop.f32.mrf.mxu0  ;;  %v3544_v13 = vadd.f32 %v3543_v56, %v3387_v50 }
 0x44c   : > { %v4297_v58 = vpop.f32.mrf.mxu1  ;;  %v3792_v0 = vadd.f32 %v3706_v57, %v3536_v59 }
 0x44d   : > { %v3708_v1 = vpop.f32.mrf.mxu0  ;;  %v3797_v8 = vadd.f32 %v4297_v58, %v3618_v63 }
 0x44e   : > { %v3783_v61 = vpop.f32.mrf.mxu1  ;;  %v3793_v10 = vadd.f32 %v3708_v1, %v3538_v62 }
 0x44f   : > { %v3712_v60 = vpop.f32.mrf.mxu0  ;;  %v3794_v14 = vadd.f32 %v3783_v61, %v3613_v3 }
 0x450   : > { %v3795_v18 = vadd.f32 %v3712_v60, %v3542_v7 }
 0x451   : > { %v3714_v2 = vpop.f32.mrf.mxu0 }
 0x452   : > { %v3883_v4 = vpop.f32.mrf.mxu1  ;;  %v3796_v21 = vadd.f32 %v3714_v2, %v3544_v13 }
 0x453   : > { %v3969_v11 = vadd.f32 %v3883_v4, %v3792_v0 }
 0x454   : > { %v3885_v15 = vpop.f32.mrf.mxu1  ;;  %v4302_v17 = vpop.f32.mrf.mxu0 }
 0x455   : > { %v3987_v19 = vadd.f32 %v3980_v6, %v3969_v11  ;;  %v3970_v20 = vadd.f32 %v3885_v15, %v3793_v10  ;;  %v3974_v53 = vadd.f32 %v4302_v17, %v3797_v8 }
 0x456   : > { %v3889_v22 = vpop.f32.mrf.mxu1  ;;  %v3960_v23 = vpop.f32.mrf.mxu0 }
 0x457   : > { %3993 = vst [vmem:[%s332_s28] sm:$0xff] %v3987_v19  ;;  %v3988_v24 = vadd.f32 %v3980_v6, %v3970_v20  ;;  %v3992_v41 = vadd.f32 %v3985_v12, %v3974_v53  ;;  %v3972_v49 = vadd.f32 %v3889_v22, %v3795_v18  ;;  %v3971_v16 = vadd.f32 %v3960_v23, %v3794_v14 }
 0x458   : > { %v3891_v25 = vpop.f32.mrf.mxu1 }
 0x459   : > { %3994 = vst [vmem:[%s332_s28 + $0x8] sm:$0xff] %v3988_v24  ;;  %3999 = vst.msk [vmem:[%s332_s28 + $0x28] sm:$0xff] %vm3995_vm12, %v3992_v41  ;;  %v3990_v26 = vadd.f32 %v3985_v12, %v3972_v49  ;;  %v3989_v27 = vadd.f32 %v3980_v6, %v3971_v16  ;;  %v3973_v28 = vadd.f32 %v3891_v25, %v3796_v21 }
 0x45b   : > { %3997 = vst [vmem:[%s332_s28 + $0x18] sm:$0xff] %v3990_v26  ;;  %3996 = vst.msk [vmem:[%s332_s28 + $0x10] sm:$0xff] %vm3995_vm12, %v3989_v27  ;;  %v3991_v29 = vadd.f32 %v3985_v12, %v3973_v28 }
 0x45d   : > { %3998 = vst [vmem:[%s332_s28 + $0x20] sm:$0xff] %v3991_v29 }
 0x45e PF: > { %s19_s30 = sadd.s32 1, %s4344_s30  }
 0x45f   : > { %p16_p4 = scmp.ge.s32.totalorder %s19_s30, 4  }
 0x461   :  { %18 = sbr.rel (!%p16_p4) target bundleno = 1 (0x1), region = 86 }

</bundles_post_ra>
